<compile_context>
chip_gen: v7x
topology: tpu7x:2x2x1
jax: 0.10.0
libtpu: 0.0.40
codegen_flags: <defaults>
</compile_context>

<pallas_src>
import functools

import jax
import jax.numpy as jnp
from jax import lax
from jax.experimental import pallas as pl
from jax.experimental.pallas import tpu as pltpu


HIDDEN = 256
FC1 = 64
NUM_CLASSES = 2


def _round_up(x, m):
    return ((x + m - 1) // m) * m


# ----------------------------------------------------------------------------
# Stage 1: batched input projection  Z = x @ W_ih^T + (b_ih + b_hh)   (bf16 out)
# ----------------------------------------------------------------------------
def _input_proj_kernel(x_ref, wih_ref, b_ref, z_ref):
    # x_ref: (TM, D) bf16, wih_ref: (D, 4H) bf16, b_ref: (1, 4H) f32, z_ref: (TM, 4H) bf16
    z_ref[...] = (
        jnp.dot(x_ref[...], wih_ref[...], preferred_element_type=jnp.float32)
        + b_ref[...]
    ).astype(jnp.bfloat16)


# ----------------------------------------------------------------------------
# Stage 2: serial LSTM recurrence over streamed Z time blocks + classifier head
# ----------------------------------------------------------------------------
def _lstm_recurrence_kernel(z_ref, whh_ref, w1_ref, b1_ref, w2_ref, b2_ref,
                            out_ref, h_ref, c_ref, *, steps_full, steps_last, unroll):
    # z_ref:   (TB, B_blk, 4H) bf16  time-major precomputed input projection block
    # whh_ref: (H, 4H) bf16          hidden->gates (pre-transposed, gates = i,f,o,g)
    # w1_ref:  (H, 64) bf16, b1_ref: (1, 64) f32
    # w2_ref:  (64, 2) f32,  b2_ref: (1, 2) f32
    # out_ref: (B_blk, 2) f32        written at the last time block only
    # h_ref:   (B_blk, H) bf16 VMEM scratch (persistent across grid steps)
    # c_ref:   (B_blk, H) f32  VMEM scratch (persistent across grid steps)
    tb = pl.program_id(1)
    n_tb = pl.num_programs(1)
    H = whh_ref.shape[0]

    @pl.when(tb == 0)
    def _():
        h_ref[...] = jnp.zeros_like(h_ref)
        c_ref[...] = jnp.zeros_like(c_ref)
        out_ref[...] = jnp.zeros_like(out_ref)

    def step(t, carry):
        h, c = carry                                  # h: bf16, c: f32
        z = jnp.dot(h, whh_ref[...], preferred_element_type=jnp.float32) + z_ref[t]
        # sigmoid(x) = 0.5*(1 + tanh(x/2)): one EUP op per vreg for the (i,f,o) slab.
        sg = 0.5 * (jnp.tanh(0.5 * z[:, :3 * H]) + 1.0)
        g = jnp.tanh(z[:, 3 * H:])
        c_new = sg[:, H:2 * H] * c + sg[:, :H] * g
        h_new = (sg[:, 2 * H:3 * H] * jnp.tanh(c_new)).astype(jnp.bfloat16)
        return h_new, c_new

    def run(nsteps):
        # Bounded-unroll fori_loop: keeps vreg live ranges small, static trip count.
        h, c = lax.fori_loop(0, nsteps, step, (h_ref[...], c_ref[...]),
                             unroll=max(1, min(unroll, nsteps)))
        h_ref[...] = h
        c_ref[...] = c

    if steps_last == steps_full:
        run(steps_full)
    else:
        # Last block only runs the real timesteps; padded steps never hit the serial path.
        @pl.when(tb < n_tb - 1)
        def _():
            run(steps_full)

        @pl.when(tb == n_tb - 1)
        def _():
            run(steps_last)

    @pl.when(tb == n_tb - 1)
    def _():
        # head: fc1 -> relu -> (dropout = identity in eval) -> fc2 -> softmax(dim=-1)
        h_last = h_ref[...]                            # bf16, == h at last real timestep
        y = jnp.dot(h_last, w1_ref[...], preferred_element_type=jnp.float32) + b1_ref[...]
        y = jnp.maximum(y, 0.0)
        logits = jnp.dot(y, w2_ref[...], preferred_element_type=jnp.float32) + b2_ref[...]
        m = jnp.max(logits, axis=-1, keepdims=True)
        e = jnp.exp(logits - m)
        out_ref[...] = e / jnp.sum(e, axis=-1, keepdims=True)


def lstm_forward(x, params, *, time_block=32, batch_blocks=1, unroll=2):
    """x: (B, T, D) float32, batch_first like PyTorch. Returns (B, 2) softmax probs.

    batch_blocks: set to 2 on v7x (2 TensorCores/chip) when the padded batch is a
    multiple of 16, so each core runs the recurrence on half the batch. Leave at 1 on
    v5e/v6e (single TensorCore) — extra blocks only add serial work there.
    """
    B, T, D = x.shape
    H = HIDDEN

    B_pad = max(8, _round_up(B, 8))                 # f32 sublane multiple

    # Size the time block from a VMEM budget: double-buffered bf16 Z block must stay
    # small on every generation (v7x has only 64 MiB physical VMEM).
    TB = _round_up(min(time_block, max(T, 1)), 8)
    while TB > 8 and 2 * TB * B_pad * 4 * H * 2 > 8 * 1024 * 1024:
        TB -= 8
    T_pad = _round_up(T, TB)

    # Optional batch split (for v7x megacore); per-block batch must stay a sublane multiple.
    n_bblk = 1
    if batch_blocks > 1 and B_pad % (8 * batch_blocks) == 0:
        n_bblk = batch_blocks
    B_blk = B_pad // n_bblk

    # --- weight prep (wrapper-side, one-time) ---
    # PyTorch gate order (i, f, g, o) -> (i, f, o, g) so the kernel uses one contiguous
    # sigmoid slab and one tanh slab.
    perm = jnp.concatenate([jnp.arange(0, 2 * H),
                            jnp.arange(3 * H, 4 * H),
                            jnp.arange(2 * H, 3 * H)])
    wih_t = params["w_ih"][perm].T.astype(jnp.bfloat16)      # (D, 4H)
    whh_t = params["w_hh"][perm].T.astype(jnp.bfloat16)      # (H, 4H)
    b = (params["b_ih"] + params["b_hh"])[perm].reshape(1, 4 * H).astype(jnp.float32)
    w1_t = params["w1"].T.astype(jnp.bfloat16)               # (H, 64)
    b1 = params["b1"].reshape(1, FC1).astype(jnp.float32)
    w2_t = params["w2"].T.astype(jnp.float32)                # (64, 2)
    b2 = params["b2"].reshape(1, NUM_CLASSES).astype(jnp.float32)

    # Pad batch/time, then lay x out time-major so the recurrence reads one contiguous
    # (B_blk, 4H) slab per step.
    x_p = jnp.pad(x, ((0, B_pad - B), (0, T_pad - T), (0, 0)))
    x_tm = jnp.transpose(x_p, (1, 0, 2))                     # (T_pad, B_pad, D)
    M = T_pad * B_pad

    vmem_cap = 32 * 1024 * 1024  # safe on v5e/v6e (128 MiB) and v7x (64 MiB)

    # ---- Stage 1: one big tiled matmul over all timesteps (TM fixed at 512) ----
    TM = 512
    M_pad = _round_up(M, TM)
    x_flat = x_tm.reshape(M, D)
    if M_pad != M:
        x_flat = jnp.pad(x_flat, ((0, M_pad - M), (0, 0)))
    x_flat = x_flat.astype(jnp.bfloat16)

    z_flat = pl.pallas_call(
        _input_proj_kernel,
        out_shape=jax.ShapeDtypeStruct((M_pad, 4 * H), jnp.bfloat16),
        grid=(M_pad // TM,),
        in_specs=[
            pl.BlockSpec((TM, D), lambda i: (i, 0)),          # x streamed over M tiles
            pl.BlockSpec((D, 4 * H), lambda i: (0, 0)),       # W_ih resident
            pl.BlockSpec((1, 4 * H), lambda i: (0, 0)),       # combined bias resident
        ],
        out_specs=pl.BlockSpec((TM, 4 * H), lambda i: (i, 0)),
        compiler_params=pltpu.CompilerParams(
            dimension_semantics=("parallel",),
            vmem_limit_bytes=vmem_cap),
    )(x_flat, wih_t, b)
    z = z_flat[:M].reshape(T_pad, B_pad, 4 * H)               # bf16

    # ---- Stage 2: recurrence streamed over time blocks, weights resident ----
    steps_last = (T - 1) % TB + 1                              # real steps in last block
    kernel = functools.partial(_lstm_recurrence_kernel,
                               steps_full=TB, steps_last=steps_last, unroll=unroll)
    out = pl.pallas_call(
        kernel,
        out_shape=jax.ShapeDtypeStruct((B_pad, NUM_CLASSES), jnp.float32),
        grid=(n_bblk, T_pad // TB),
        in_specs=[
            pl.BlockSpec((TB, B_blk, 4 * H), lambda b, t: (t, b, 0)),  # Z streamed in time
            pl.BlockSpec((H, 4 * H), lambda b, t: (0, 0)),             # W_hh resident
            pl.BlockSpec((H, FC1), lambda b, t: (0, 0)),               # W1 resident
            pl.BlockSpec((1, FC1), lambda b, t: (0, 0)),
            pl.BlockSpec((FC1, NUM_CLASSES), lambda b, t: (0, 0)),
            pl.BlockSpec((1, NUM_CLASSES), lambda b, t: (0, 0)),
        ],
        out_specs=pl.BlockSpec((B_blk, NUM_CLASSES), lambda b, t: (b, 0)),
        scratch_shapes=[
            pltpu.VMEM((B_blk, H), jnp.bfloat16),   # h (matmul operand -> bf16 storage)
            pltpu.VMEM((B_blk, H), jnp.float32),    # c (cell state stays f32)
        ],
        compiler_params=pltpu.CompilerParams(
            dimension_semantics=("parallel", "arbitrary"),   # batch parallel, time serial
            vmem_limit_bytes=vmem_cap),
    )(z, whh_t, w1_t, b1, w2_t, b2)

    return out[:B]


def init_params(key, input_size):
    """Deterministic synthetic params matching nn.LSTM / nn.Linear shapes."""
    ks = jax.random.split(key, 8)
    s_lstm = 1.0 / jnp.sqrt(HIDDEN)
    s_fc1 = 1.0 / jnp.sqrt(HIDDEN)
    s_fc2 = 1.0 / jnp.sqrt(FC1)
    u = lambda k, shape, s: jax.random.uniform(k, shape, jnp.float32, -s, s)
    return {
        "w_ih": u(ks[0], (4 * HIDDEN, input_size), s_lstm),
        "w_hh": u(ks[1], (4 * HIDDEN, HIDDEN), s_lstm),
        "b_ih": u(ks[2], (4 * HIDDEN,), s_lstm),
        "b_hh": u(ks[3], (4 * HIDDEN,), s_lstm),
        "w1": u(ks[4], (FC1, HIDDEN), s_fc1),
        "b1": u(ks[5], (FC1,), s_fc1),
        "w2": u(ks[6], (NUM_CLASSES, FC1), s_fc2),
        "b2": u(ks[7], (NUM_CLASSES,), s_fc2),
    }


def reference_forward(x, params):
    """Pure-JAX f32 reference (mirrors PyTorch semantics) for correctness check."""
    B, T, D = x.shape
    wih_t = params["w_ih"].T
    whh_t = params["w_hh"].T
    b = params["b_ih"] + params["b_hh"]

    def step(carry, x_t):
        h, c = carry
        z = x_t @ wih_t + h @ whh_t + b
        i_g = jax.nn.sigmoid(z[:, 0:HIDDEN])
        f_g = jax.nn.sigmoid(z[:, HIDDEN:2 * HIDDEN])
        g_g = jnp.tanh(z[:, 2 * HIDDEN:3 * HIDDEN])
        o_g = jax.nn.sigmoid(z[:, 3 * HIDDEN:4 * HIDDEN])
        c = f_g * c + i_g * g_g
        h = o_g * jnp.tanh(c)
        return (h, c), None

    h0 = jnp.zeros((B, HIDDEN), jnp.float32)
    c0 = jnp.zeros((B, HIDDEN), jnp.float32)
    (h, _), _ = jax.lax.scan(step, (h0, c0), jnp.transpose(x, (1, 0, 2)))
    y = jnp.maximum(h @ params["w1"].T + params["b1"], 0.0)
    logits = y @ params["w2"].T + params["b2"]
    return jax.nn.softmax(logits, axis=-1)


if __name__ == "__main__":
    B, T, D = 2, 8, 32
    key = jax.random.PRNGKey(0)
    k_x, k_p = jax.random.split(key)
    x = jax.random.normal(k_x, (B, T, D), jnp.float32)
    params = init_params(k_p, D)

    out = lstm_forward(x, params)
    out = jax.block_until_ready(out)

    ref = reference_forward(x, params)
    assert out.shape == (B, NUM_CLASSES)
    # bf16 matmul operands + bf16 Z storage (f32 accumulation) => relaxed tolerance vs f32 ref.
    assert jnp.allclose(out, ref, atol=3e-2, rtol=3e-2), (out, ref)
    print("KERNEL_OK")
</pallas_src>

<mosaic_0001>
module attributes {stable_mosaic.version = 11 : i64} {
  func.func @_input_proj_kernel(%arg0: i32, %arg1: memref<512x32xbf16, #tpu.memory_space<vmem>>, %arg2: memref<32x1024xbf16, #tpu.memory_space<vmem>>, %arg3: memref<1x1024xf32, #tpu.memory_space<vmem>>, %arg4: memref<512x1024xbf16, #tpu.memory_space<vmem>>) attributes {dimension_semantics = [#tpu.dimension_semantics<parallel>], iteration_bounds = array<i64: 1>, scalar_prefetch = 0 : i64, scratch_operands = 0 : i64, tpu.core_type = #tpu.core_type<tc>, window_params = [{transform_indices = @transform_0, window_bounds = array<i64: 512, 32>}, {pipeline_mode = #tpu.pipeline_mode<synchronous>, transform_indices = @transform_1, window_bounds = array<i64: 32, 1024>}, {pipeline_mode = #tpu.pipeline_mode<synchronous>, transform_indices = @transform_2, window_bounds = array<i64: 1, 1024>}, {transform_indices = @transform_3, window_bounds = array<i64: 512, 1024>}]} {
    %c0 = arith.constant 0 : index
    %c0_0 = arith.constant 0 : index
    %0 = vector.load %arg1[%c0, %c0_0] : memref<512x32xbf16, #tpu.memory_space<vmem>>, vector<512x32xbf16>
    %c0_1 = arith.constant 0 : index
    %c0_2 = arith.constant 0 : index
    %1 = vector.load %arg2[%c0_1, %c0_2] : memref<32x1024xbf16, #tpu.memory_space<vmem>>, vector<32x1024xbf16>
    %cst = arith.constant dense<0.000000e+00> : vector<512x1024xf32>
    %2 = tpu.matmul %0, %1, %cst {dimension_numbers = #tpu.dot_dimension_numbers<[1], [0], [0], [1], [0, 0, 1, 1], [], []>} : vector<512x32xbf16>, vector<32x1024xbf16>, vector<512x1024xf32> -> vector<512x1024xf32>
    %c0_3 = arith.constant 0 : index
    %c0_4 = arith.constant 0 : index
    %3 = vector.load %arg3[%c0_3, %c0_4] : memref<1x1024xf32, #tpu.memory_space<vmem>>, vector<1x1024xf32>
    %4 = vector.broadcast %3 : vector<1x1024xf32> to vector<512x1024xf32>
    %5 = arith.addf %2, %4 : vector<512x1024xf32>
    %6 = arith.truncf %5 : vector<512x1024xf32> to vector<512x1024xbf16>
    %c0_5 = arith.constant 0 : index
    %c0_6 = arith.constant 0 : index
    %7 = vector.load %arg4[%c0_5, %c0_6] : memref<512x1024xbf16, #tpu.memory_space<vmem>>, vector<512x1024xbf16>
    tpu.vector_store %arg4[%c0_5, %c0_6], %6 {strides = array<i32>} : memref<512x1024xbf16, #tpu.memory_space<vmem>>, vector<512x1024xbf16>,
    return
  }
  func.func @transform_0(%arg0: i32) -> (i32, i32) {
    %c0_i32 = arith.constant 0 : i32
    %c0_i32_0 = arith.constant 0 : i32
    return %arg0, %c0_i32 : i32, i32
  }
  func.func @transform_1(%arg0: i32) -> (i32, i32) {
    %c0_i32 = arith.constant 0 : i32
    %c0_i32_0 = arith.constant 0 : i32
    %c0_i32_1 = arith.constant 0 : i32
    return %c0_i32, %c0_i32_0 : i32, i32
  }
  func.func @transform_2(%arg0: i32) -> (i32, i32) {
    %c0_i32 = arith.constant 0 : i32
    %c0_i32_0 = arith.constant 0 : i32
    %c0_i32_1 = arith.constant 0 : i32
    return %c0_i32, %c0_i32_0 : i32, i32
  }
  func.func @transform_3(%arg0: i32) -> (i32, i32) {
    %c0_i32 = arith.constant 0 : i32
    %c0_i32_0 = arith.constant 0 : i32
    return %arg0, %c0_i32 : i32, i32
  }
}

</mosaic_0001>

<bundles_post_ra>
// kernel: tpu_custom_call.1
= control target key start
LH: loop header
LB: loop body
LE: loop exit
PB: predicated region body
PF: predicated region fallthrough
CT: control target
= control target key end

     0   :  { %v4467_v8 = vmov 0   ;;  %vm378_vm0 = vcmask 261120   ;;  %s5570_s0 = inlined_call_operand.vmem [shape: bf16[512,32], index: 0, kind: input, shape index: {}]   ;;  %s5571_s1 = inlined_call_operand.vmem [shape: bf16[32,1024], index: 1, kind: input, shape index: {}]   ;;  %s5572_s2 = inlined_call_operand.vmem [shape: f32[1,1024], index: 2, kind: input, shape index: {}]   ;;  %s5573_s3 = inlined_call_operand.hbm [shape: bf16[512,1024], index: 3, kind: output, shape index: {}]  }
   0x1   :  { %v80_v0 = vld [vmem:[%s5571_s1] sm:$0xff]  ;;  %v81_v2 = vld [vmem:[%s5571_s1 + $0x8] sm:$0xff]  ;;  %507 = vmatprep.mubr.bf16.mxu0 %v4467_v8  ;;  %860 = vmatprep.mubr.bf16.mxu1 %v4467_v8  ;;  %v82_v15 = vld [vmem:[%s5571_s1 + $0x10] sm:$0xff] }
   0x2   :  { %v84_v1 = vld [vmem:[%s5571_s1 + $0x20] sm:$0xff]  ;;  %v85_v4 = vld [vmem:[%s5571_s1 + $0x28] sm:$0xff]  ;;  %v86_v17 = vld [vmem:[%s5571_s1 + $0x30] sm:$0xff] }
   0x3   :  { %v3728_v3 = vcombine.high %v80_v0, %v84_v1  ;;  %v3727_v5 = vcombine.low %v80_v0, %v84_v1  ;;  %v88_v6 = vld [vmem:[%s5571_s1 + $0x40] sm:$0xff]  ;;  %v3730_v9 = vcombine.high %v81_v2, %v85_v4  ;;  %v3729_v10 = vcombine.low %v81_v2, %v85_v4  ;;  %v89_v12 = vld [vmem:[%s5571_s1 + $0x48] sm:$0xff]  ;;  %v83_v18 = vld [vmem:[%s5571_s1 + $0x18] sm:$0xff] }
   0x4   :  { %v92_v7 = vld [vmem:[%s5571_s1 + $0x60] sm:$0xff]  ;;  %v93_v13 = vld [vmem:[%s5571_s1 + $0x68] sm:$0xff]  ;;  %v87_v19 = vld [vmem:[%s5571_s1 + $0x38] sm:$0xff]  ;;  %v3732_v21 = vcombine.high %v82_v15, %v86_v17  ;;  %v3731_v24 = vcombine.low %v82_v15, %v86_v17 }
   0x5   :  { %v3736_v11 = vcombine.high %v88_v6, %v92_v7  ;;  %475 = vmatprep.subr.bf16.mxu0 %v3728_v3  ;;  %v3738_v14 = vcombine.high %v89_v12, %v93_v13  ;;  %828 = vmatprep.subr.bf16.mxu1 %v3730_v9  ;;  %v3735_v16 = vcombine.low %v88_v6, %v92_v7  ;;  %v4532_v23 = vld [vmem:[%s5570_s0] sm:$0xff]   ;;  %v4543_v26 = vld [vmem:[%s5570_s0 + $0x8] sm:$0xff]   ;;  %v90_v27 = vld [vmem:[%s5571_s1 + $0x50] sm:$0xff] }
   0x6   :  { %476 = vmatpush1.bf16.msra.mxu0 %v3727_v5  ;;  %829 = vmatpush1.bf16.msra.mxu1 %v3729_v10  ;;  %v3737_v20 = vcombine.low %v89_v12, %v93_v13  ;;  %v3734_v22 = vcombine.high %v83_v18, %v87_v19  ;;  %v3733_v25 = vcombine.low %v83_v18, %v87_v19  ;;  %v94_v28 = vld [vmem:[%s5571_s1 + $0x70] sm:$0xff]  ;;  %v91_v29 = vld [vmem:[%s5571_s1 + $0x58] sm:$0xff] }
   0x7   :  { %477 = vmatprep.subr.bf16.mxu0 %v3736_v11  ;;  %830 = vmatprep.subr.bf16.mxu1 %v3738_v14  ;;  %v3739_v30 = vcombine.low %v90_v27, %v94_v28  ;;  %v3740_v31 = vcombine.high %v90_v27, %v94_v28  ;;  %v95_v32 = vld [vmem:[%s5571_s1 + $0x78] sm:$0xff]  ;;  %v4566_v33 = vld [vmem:[%s5570_s0 + $0x10] sm:$0xff]  }
   0x8   :  { %v3741_v34 = vcombine.low %v91_v29, %v95_v32  ;;  %v3742_v35 = vcombine.high %v91_v29, %v95_v32  ;;  %v4577_v36 = vld [vmem:[%s5570_s0 + $0x18] sm:$0xff]  }
   0xa   :  { %478 = vmatpush1.bf16.msra.mxu0 %v3735_v16  ;;  %831 = vmatpush1.bf16.msra.mxu1 %v3737_v20 }
   0xb   :  { %1181 = vmatprep.subr.bf16.mxu0 %v3732_v21  ;;  %1534 = vmatprep.subr.bf16.mxu1 %v3734_v22 }
   0xd   :  { %3743 = vmatmul.mubr.msk.bf16.vlgmr.msra.gmra.mrb[0].mxu0 %vm378_vm0, %v4532_v23  ;;  %3775 = vmatmul.mubr.msk.bf16.vlgmr.msra.gmra.mrb[0].mxu1 %vm378_vm0, %v4532_v23 }
   0xe   :  { %1182 = vmatpush1.bf16.msra.mxu0 %v3731_v24  ;;  %1535 = vmatpush1.bf16.msra.mxu1 %v3733_v25 }
   0xf   :  { %517 = vmatprep.mubr.bf16.mxu0 %v4467_v8  ;;  %870 = vmatprep.mubr.bf16.mxu1 %v4467_v8 }
  0x10   :  { %1183 = vmatprep.subr.bf16.mxu0 %v3740_v31  ;;  %1536 = vmatprep.subr.bf16.mxu1 %v3742_v35 }
  0x12   :  { %1184 = vmatpush1.bf16.msra.mxu0 %v3739_v30  ;;  %1537 = vmatpush1.bf16.msra.mxu1 %v3741_v34 }
  0x15   :  { %3744 = vmatmul.mubr.msk.bf16.gmra.mrb[4].mxu0 %vm378_vm0, %v4543_v26  ;;  %3776 = vmatmul.mubr.msk.bf16.gmra.mrb[4].mxu1 %vm378_vm0, %v4543_v26 }
  0x16   :  { %527 = vmatprep.mubr.bf16.mxu0 %v4467_v8  ;;  %880 = vmatprep.mubr.bf16.mxu1 %v4467_v8 }
  0x1d   :  { %3745 = vmatmul.mubr.msk.bf16.gmra.mrb[8].mxu0 %vm378_vm0, %v4566_v33  ;;  %3777 = vmatmul.mubr.msk.bf16.gmra.mrb[8].mxu1 %vm378_vm0, %v4566_v33 }
  0x1e   :  { %537 = vmatprep.mubr.bf16.mxu0 %v4467_v8  ;;  %890 = vmatprep.mubr.bf16.mxu1 %v4467_v8 }
  0x1f   :  { %8 = vsyncpa [#allocation3], 0  ;;  %v4588_v37 = vld [vmem:[%s5570_s0 + $0x20] sm:$0xff]   ;;  %v4599_v38 = vld [vmem:[%s5570_s0 + $0x28] sm:$0xff]   ;;  %v98_v59 = vlaneseq }
  0x20   :  { %v4610_v39 = vld [vmem:[%s5570_s0 + $0x30] sm:$0xff]   ;;  %v4621_v40 = vld [vmem:[%s5570_s0 + $0x38] sm:$0xff]   ;;  %v4632_v41 = vld [vmem:[%s5570_s0 + $0x40] sm:$0xff]  }
  0x21   :  { %v4396_v42 = vld [vmem:[%s5570_s0 + $0x48] sm:$0xff]   ;;  %v4397_v43 = vld [vmem:[%s5570_s0 + $0x50] sm:$0xff]   ;;  %v4398_v44 = vld [vmem:[%s5570_s0 + $0x58] sm:$0xff]   ;;  %v4756_v60 = vshrl.u32 %v98_v59, 7 }
  0x22   :  { %v4399_v45 = vld [vmem:[%s5570_s0 + $0x60] sm:$0xff]   ;;  %v4400_v46 = vld [vmem:[%s5570_s0 + $0x68] sm:$0xff]   ;;  %v4401_v47 = vld [vmem:[%s5570_s0 + $0x70] sm:$0xff]  }
  0x23   :  { %v4402_v48 = vld [vmem:[%s5570_s0 + $0x78] sm:$0xff]   ;;  %v4403_v49 = vld [vmem:[%s5570_s0 + $0x80] sm:$0xff]   ;;  %v4404_v50 = vld [vmem:[%s5570_s0 + $0x88] sm:$0xff]   ;;  %v100_v62 = vsub.s32 0, %v4756_v60  ;;  %v108_v0 = vsub.s32 2, %v4756_v60  ;;  %v104_v1 = vsub.s32 1, %v4756_v60 }
  0x24   :  { %v4405_v51 = vld [vmem:[%s5570_s0 + $0x90] sm:$0xff]   ;;  %v4406_v52 = vld [vmem:[%s5570_s0 + $0x98] sm:$0xff]   ;;  %v4407_v53 = vld [vmem:[%s5570_s0 + $0xa0] sm:$0xff]   ;;  %v112_v2 = vsub.s32 3, %v4756_v60 }
  0x25   :  { %3746 = vmatmul.mubr.msk.bf16.gmra.mrb[12].mxu0 %vm378_vm0, %v4577_v36  ;;  %3778 = vmatmul.mubr.msk.bf16.gmra.mrb[12].mxu1 %vm378_vm0, %v4577_v36  ;;  %v4408_v54 = vld [vmem:[%s5570_s0 + $0xa8] sm:$0xff]   ;;  %v4409_v55 = vld [vmem:[%s5570_s0 + $0xb0] sm:$0xff]   ;;  %v4410_v56 = vld [vmem:[%s5570_s0 + $0xb8] sm:$0xff]  }
  0x26   :  { %547 = vmatprep.mubr.bf16.mxu0 %v4467_v8  ;;  %900 = vmatprep.mubr.bf16.mxu1 %v4467_v8  ;;  %v4411_v57 = vld [vmem:[%s5570_s0 + $0xc0] sm:$0xff]   ;;  %v4412_v58 = vld [vmem:[%s5570_s0 + $0xc8] sm:$0xff]   ;;  %v4413_v61 = vld [vmem:[%s5570_s0 + $0xd0] sm:$0xff]  }
  0x27   :  { %v96_v63 = vld [vmem:[%s5572_s2] sm:$0xff]  ;;  %v4414_v12 = vld [vmem:[%s5570_s0 + $0xd8] sm:$0xff]  }
  0x28   :  { %v4772_v3 = vrot.slane %v96_v63, %v100_v62  ;;  %v4775_v4 = vrot.slane %v96_v63, %v108_v0  ;;  %v4777_v5 = vrot.slane %v96_v63, %v104_v1  ;;  %v4780_v6 = vrot.slane %v96_v63, %v112_v2  ;;  %v4416_v0 = vld [vmem:[%s5570_s0 + $0xe8] sm:$0xff]  }
  0x2d   :  { %3747 = vmatmul.mubr.msk.bf16.gmra.mrb[16].mxu0 %vm378_vm0, %v4588_v37  ;;  %3779 = vmatmul.mubr.msk.bf16.gmra.mrb[16].mxu1 %vm378_vm0, %v4588_v37 }
  0x2e   :  { %557 = vmatprep.mubr.bf16.mxu0 %v4467_v8  ;;  %910 = vmatprep.mubr.bf16.mxu1 %v4467_v8 }
  0x35   :  { %3748 = vmatmul.mubr.msk.bf16.gmra.mrb[20].mxu0 %vm378_vm0, %v4599_v38  ;;  %3780 = vmatmul.mubr.msk.bf16.gmra.mrb[20].mxu1 %vm378_vm0, %v4599_v38 }
  0x36   :  { %567 = vmatprep.mubr.bf16.mxu0 %v4467_v8  ;;  %920 = vmatprep.mubr.bf16.mxu1 %v4467_v8 }
  0x3d   :  { %3749 = vmatmul.mubr.msk.bf16.gmra.mrb[24].mxu0 %vm378_vm0, %v4610_v39  ;;  %3781 = vmatmul.mubr.msk.bf16.gmra.mrb[24].mxu1 %vm378_vm0, %v4610_v39 }
  0x3e   :  { %577 = vmatprep.mubr.bf16.mxu0 %v4467_v8  ;;  %930 = vmatprep.mubr.bf16.mxu1 %v4467_v8 }
  0x45   :  { %3750 = vmatmul.mubr.msk.bf16.gmra.mrb[28].mxu0 %vm378_vm0, %v4621_v40  ;;  %3782 = vmatmul.mubr.msk.bf16.gmra.mrb[28].mxu1 %vm378_vm0, %v4621_v40 }
  0x46   :  { %587 = vmatprep.mubr.bf16.mxu0 %v4467_v8  ;;  %940 = vmatprep.mubr.bf16.mxu1 %v4467_v8 }
  0x4d   :  { %3751 = vmatmul.mubr.msk.bf16.gmra.mrb[32].mxu0 %vm378_vm0, %v4632_v41  ;;  %3783 = vmatmul.mubr.msk.bf16.gmra.mrb[32].mxu1 %vm378_vm0, %v4632_v41 }
  0x4e   :  { %597 = vmatprep.mubr.bf16.mxu0 %v4467_v8  ;;  %950 = vmatprep.mubr.bf16.mxu1 %v4467_v8 }
  0x55   :  { %3752 = vmatmul.mubr.msk.bf16.gmra.mrb[36].mxu0 %vm378_vm0, %v4396_v42  ;;  %3784 = vmatmul.mubr.msk.bf16.gmra.mrb[36].mxu1 %vm378_vm0, %v4396_v42  ;;  %v4415_v42 = vld [vmem:[%s5570_s0 + $0xe0] sm:$0xff]  }
  0x56   :  { %607 = vmatprep.mubr.bf16.mxu0 %v4467_v8  ;;  %960 = vmatprep.mubr.bf16.mxu1 %v4467_v8 }
  0x5d   :  { %3753 = vmatmul.mubr.msk.bf16.gmra.mrb[40].mxu0 %vm378_vm0, %v4397_v43  ;;  %3785 = vmatmul.mubr.msk.bf16.gmra.mrb[40].mxu1 %vm378_vm0, %v4397_v43 }
  0x5e   :  { %617 = vmatprep.mubr.bf16.mxu0 %v4467_v8  ;;  %970 = vmatprep.mubr.bf16.mxu1 %v4467_v8 }
  0x65   :  { %3754 = vmatmul.mubr.msk.bf16.gmra.mrb[44].mxu0 %vm378_vm0, %v4398_v44  ;;  %3786 = vmatmul.mubr.msk.bf16.gmra.mrb[44].mxu1 %vm378_vm0, %v4398_v44 }
  0x66   :  { %627 = vmatprep.mubr.bf16.mxu0 %v4467_v8  ;;  %980 = vmatprep.mubr.bf16.mxu1 %v4467_v8 }
  0x6d   :  { %3755 = vmatmul.mubr.msk.bf16.gmra.mrb[48].mxu0 %vm378_vm0, %v4399_v45  ;;  %3787 = vmatmul.mubr.msk.bf16.gmra.mrb[48].mxu1 %vm378_vm0, %v4399_v45 }
  0x6e   :  { %637 = vmatprep.mubr.bf16.mxu0 %v4467_v8  ;;  %990 = vmatprep.mubr.bf16.mxu1 %v4467_v8 }
  0x75   :  { %3756 = vmatmul.mubr.msk.bf16.gmra.mrb[52].mxu0 %vm378_vm0, %v4400_v46  ;;  %3788 = vmatmul.mubr.msk.bf16.gmra.mrb[52].mxu1 %vm378_vm0, %v4400_v46 }
  0x76   :  { %647 = vmatprep.mubr.bf16.mxu0 %v4467_v8  ;;  %1000 = vmatprep.mubr.bf16.mxu1 %v4467_v8 }
  0x7d   :  { %3757 = vmatmul.mubr.msk.bf16.gmra.mrb[56].mxu0 %vm378_vm0, %v4401_v47  ;;  %3789 = vmatmul.mubr.msk.bf16.gmra.mrb[56].mxu1 %vm378_vm0, %v4401_v47 }
  0x7e   :  { %657 = vmatprep.mubr.bf16.mxu0 %v4467_v8  ;;  %1010 = vmatprep.mubr.bf16.mxu1 %v4467_v8 }
  0x85   :  { %3758 = vmatmul.mubr.msk.bf16.gmra.mrb[60].mxu0 %vm378_vm0, %v4402_v48  ;;  %3790 = vmatmul.mubr.msk.bf16.gmra.mrb[60].mxu1 %vm378_vm0, %v4402_v48 }
  0x86   :  { %667 = vmatprep.mubr.bf16.mxu0 %v4467_v8  ;;  %1020 = vmatprep.mubr.bf16.mxu1 %v4467_v8 }
  0x8d   :  { %3759 = vmatmul.mubr.msk.bf16.gmra.mrb[64].mxu0 %vm378_vm0, %v4403_v49  ;;  %3791 = vmatmul.mubr.msk.bf16.gmra.mrb[64].mxu1 %vm378_vm0, %v4403_v49 }
  0x8e   :  { %677 = vmatprep.mubr.bf16.mxu0 %v4467_v8  ;;  %1030 = vmatprep.mubr.bf16.mxu1 %v4467_v8 }
  0x95   :  { %3760 = vmatmul.mubr.msk.bf16.gmra.mrb[68].mxu0 %vm378_vm0, %v4404_v50  ;;  %3792 = vmatmul.mubr.msk.bf16.gmra.mrb[68].mxu1 %vm378_vm0, %v4404_v50 }
  0x96   :  { %687 = vmatprep.mubr.bf16.mxu0 %v4467_v8  ;;  %1040 = vmatprep.mubr.bf16.mxu1 %v4467_v8 }
  0x9d   :  { %3761 = vmatmul.mubr.msk.bf16.gmra.mrb[72].mxu0 %vm378_vm0, %v4405_v51  ;;  %3793 = vmatmul.mubr.msk.bf16.gmra.mrb[72].mxu1 %vm378_vm0, %v4405_v51 }
  0x9e   :  { %697 = vmatprep.mubr.bf16.mxu0 %v4467_v8  ;;  %1050 = vmatprep.mubr.bf16.mxu1 %v4467_v8 }
  0xa5   :  { %3762 = vmatmul.mubr.msk.bf16.gmra.mrb[76].mxu0 %vm378_vm0, %v4406_v52  ;;  %3794 = vmatmul.mubr.msk.bf16.gmra.mrb[76].mxu1 %vm378_vm0, %v4406_v52 }
  0xa6   :  { %707 = vmatprep.mubr.bf16.mxu0 %v4467_v8  ;;  %1060 = vmatprep.mubr.bf16.mxu1 %v4467_v8 }
  0xad   :  { %3763 = vmatmul.mubr.msk.bf16.gmra.mrb[80].mxu0 %vm378_vm0, %v4407_v53  ;;  %3795 = vmatmul.mubr.msk.bf16.gmra.mrb[80].mxu1 %vm378_vm0, %v4407_v53 }
  0xae   :  { %717 = vmatprep.mubr.bf16.mxu0 %v4467_v8  ;;  %1070 = vmatprep.mubr.bf16.mxu1 %v4467_v8 }
  0xb5   :  { %3764 = vmatmul.mubr.msk.bf16.gmra.mrb[84].mxu0 %vm378_vm0, %v4408_v54  ;;  %3796 = vmatmul.mubr.msk.bf16.gmra.mrb[84].mxu1 %vm378_vm0, %v4408_v54 }
  0xb6   :  { %727 = vmatprep.mubr.bf16.mxu0 %v4467_v8  ;;  %1080 = vmatprep.mubr.bf16.mxu1 %v4467_v8 }
  0xbd   :  { %3765 = vmatmul.mubr.msk.bf16.gmra.mrb[88].mxu0 %vm378_vm0, %v4409_v55  ;;  %3797 = vmatmul.mubr.msk.bf16.gmra.mrb[88].mxu1 %vm378_vm0, %v4409_v55 }
  0xbe   :  { %737 = vmatprep.mubr.bf16.mxu0 %v4467_v8  ;;  %1090 = vmatprep.mubr.bf16.mxu1 %v4467_v8 }
  0xc5   :  { %3766 = vmatmul.mubr.msk.bf16.gmra.mrb[92].mxu0 %vm378_vm0, %v4410_v56  ;;  %3798 = vmatmul.mubr.msk.bf16.gmra.mrb[92].mxu1 %vm378_vm0, %v4410_v56 }
  0xc6   :  { %747 = vmatprep.mubr.bf16.mxu0 %v4467_v8  ;;  %1100 = vmatprep.mubr.bf16.mxu1 %v4467_v8 }
  0xcd   :  { %3767 = vmatmul.mubr.msk.bf16.gmra.mrb[96].mxu0 %vm378_vm0, %v4411_v57  ;;  %3799 = vmatmul.mubr.msk.bf16.gmra.mrb[96].mxu1 %vm378_vm0, %v4411_v57 }
  0xce   :  { %757 = vmatprep.mubr.bf16.mxu0 %v4467_v8  ;;  %1110 = vmatprep.mubr.bf16.mxu1 %v4467_v8 }
  0xd5   :  { %3768 = vmatmul.mubr.msk.bf16.gmra.mrb[100].mxu0 %vm378_vm0, %v4412_v58  ;;  %3800 = vmatmul.mubr.msk.bf16.gmra.mrb[100].mxu1 %vm378_vm0, %v4412_v58 }
  0xd6   :  { %767 = vmatprep.mubr.bf16.mxu0 %v4467_v8  ;;  %1120 = vmatprep.mubr.bf16.mxu1 %v4467_v8 }
  0xdd   :  { %3769 = vmatmul.mubr.msk.bf16.gmra.mrb[104].mxu0 %vm378_vm0, %v4413_v61  ;;  %3801 = vmatmul.mubr.msk.bf16.gmra.mrb[104].mxu1 %vm378_vm0, %v4413_v61 }
  0xde   :  { %777 = vmatprep.mubr.bf16.mxu0 %v4467_v8  ;;  %1130 = vmatprep.mubr.bf16.mxu1 %v4467_v8 }
  0xe0   :  { %v509_v7 = vpop.f32.mrb[0].mxu0  ;;  %v862_v10 = vpop.f32.mrb[0].mxu1 }
  0xe1   :  { %v510_v9 = vadd.f32 %v509_v7, %v4772_v3  ;;  %v511_v11 = vpop.f32.mrb[1].mxu0  ;;  %v863_v13 = vadd.f32 %v862_v10, %v4775_v4  ;;  %v864_v15 = vpop.f32.mrb[1].mxu1 }
  0xe2   :  { %v512_v14 = vadd.f32 %v511_v11, %v4777_v5  ;;  %v513_v16 = vpop.f32.mrb[2].mxu0  ;;  %v865_v17 = vadd.f32 %v864_v15, %v4780_v6  ;;  %v866_v19 = vpop.f32.mrb[2].mxu1 }
  0xe3   :  { %v514_v18 = vadd.f32 %v513_v16, %v4772_v3  ;;  %v515_v20 = vpop.f32.mrb[3].mxu0  ;;  %v867_v22 = vadd.f32 %v866_v19, %v4775_v4  ;;  %v868_v25 = vpop.f32.mrb[3].mxu1 }
  0xe4   :  { %v4127_v21 = vpack.c.bf16 %v512_v14, %v510_v9  ;;  %v516_v24 = vadd.f32 %v515_v20, %v4777_v5  ;;  %v4128_v27 = vpack.c.bf16 %v865_v17, %v863_v13  ;;  %v869_v28 = vadd.f32 %v868_v25, %v4780_v6 }
  0xe5   :  { %3770 = vmatmul.mubr.msk.bf16.gmra.mrb[108].mxu0 %vm378_vm0, %v4414_v12  ;;  %3802 = vmatmul.mubr.msk.bf16.gmra.mrb[108].mxu1 %vm378_vm0, %v4414_v12 }
  0xe6   :  { %3423 = vst [vmem:[#allocation2] sm:$0xff] %v4127_v21  ;;  %v4131_v29 = vpack.c.bf16 %v516_v24, %v514_v18  ;;  %787 = vmatprep.mubr.bf16.mxu0 %v4467_v8  ;;  %3424 = vst [vmem:[#allocation2 + $0x8] sm:$0xff] %v4128_v27  ;;  %v4132_v30 = vpack.c.bf16 %v869_v28, %v867_v22  ;;  %1140 = vmatprep.mubr.bf16.mxu1 %v4467_v8  ;;  %v4417_v28 = vld [vmem:[%s5570_s0 + $0xf0] sm:$0xff]  }
  0xe8   :  { %3427 = vst [vmem:[#allocation2 + $0x20] sm:$0xff] %v4131_v29  ;;  %v519_v31 = vpop.f32.mrb[4].mxu0  ;;  %3428 = vst [vmem:[#allocation2 + $0x28] sm:$0xff] %v4132_v30  ;;  %v872_v34 = vpop.f32.mrb[4].mxu1 }
  0xe9   :  { %v520_v32 = vadd.f32 %v519_v31, %v4772_v3  ;;  %v521_v35 = vpop.f32.mrb[5].mxu0  ;;  %v873_v43 = vadd.f32 %v872_v34, %v4775_v4  ;;  %v874_v45 = vpop.f32.mrb[5].mxu1 }
  0xea   :  { %v522_v44 = vadd.f32 %v521_v35, %v4777_v5  ;;  %v523_v46 = vpop.f32.mrb[6].mxu0  ;;  %v875_v47 = vadd.f32 %v874_v45, %v4780_v6  ;;  %v876_v49 = vpop.f32.mrb[6].mxu1 }
  0xeb   :  { %v524_v48 = vadd.f32 %v523_v46, %v4772_v3  ;;  %v525_v50 = vpop.f32.mrb[7].mxu0  ;;  %v877_v52 = vadd.f32 %v876_v49, %v4775_v4  ;;  %v878_v54 = vpop.f32.mrb[7].mxu1 }
  0xec   :  { %v4135_v51 = vpack.c.bf16 %v522_v44, %v520_v32  ;;  %v526_v53 = vadd.f32 %v525_v50, %v4777_v5  ;;  %v4136_v55 = vpack.c.bf16 %v875_v47, %v873_v43  ;;  %v879_v56 = vadd.f32 %v878_v54, %v4780_v6 }
  0xed   :  { %3771 = vmatmul.mubr.msk.bf16.gmra.mrb[112].mxu0 %vm378_vm0, %v4415_v42  ;;  %3803 = vmatmul.mubr.msk.bf16.gmra.mrb[112].mxu1 %vm378_vm0, %v4415_v42 }
  0xee   :  { %3431 = vst [vmem:[#allocation2 + $0x40] sm:$0xff] %v4135_v51  ;;  %v4139_v57 = vpack.c.bf16 %v526_v53, %v524_v48  ;;  %797 = vmatprep.mubr.bf16.mxu0 %v4467_v8  ;;  %3432 = vst [vmem:[#allocation2 + $0x48] sm:$0xff] %v4136_v55  ;;  %v4140_v58 = vpack.c.bf16 %v879_v56, %v877_v52  ;;  %1150 = vmatprep.mubr.bf16.mxu1 %v4467_v8  ;;  %v4418_v56 = vld [vmem:[%s5570_s0 + $0xf8] sm:$0xff]  }
  0xf0   :  { %3435 = vst [vmem:[#allocation2 + $0x60] sm:$0xff] %v4139_v57  ;;  %v529_v59 = vpop.f32.mrb[8].mxu0  ;;  %3436 = vst [vmem:[#allocation2 + $0x68] sm:$0xff] %v4140_v58  ;;  %v882_v62 = vpop.f32.mrb[8].mxu1 }
  0xf1   :  { %v530_v61 = vadd.f32 %v529_v59, %v4772_v3  ;;  %v531_v63 = vpop.f32.mrb[9].mxu0  ;;  %v883_v1 = vadd.f32 %v882_v62, %v4775_v4  ;;  %v884_v7 = vpop.f32.mrb[9].mxu1 }
  0xf2   :  { %v532_v2 = vadd.f32 %v531_v63, %v4777_v5  ;;  %v533_v9 = vpop.f32.mrb[10].mxu0  ;;  %v885_v10 = vadd.f32 %v884_v7, %v4780_v6  ;;  %v886_v12 = vpop.f32.mrb[10].mxu1 }
  0xf3   :  { %v534_v11 = vadd.f32 %v533_v9, %v4772_v3  ;;  %v535_v13 = vpop.f32.mrb[11].mxu0  ;;  %v887_v15 = vadd.f32 %v886_v12, %v4775_v4  ;;  %v888_v17 = vpop.f32.mrb[11].mxu1 }
  0xf4   :  { %v4143_v14 = vpack.c.bf16 %v532_v2, %v530_v61  ;;  %v536_v16 = vadd.f32 %v535_v13, %v4777_v5  ;;  %v4144_v18 = vpack.c.bf16 %v885_v10, %v883_v1  ;;  %v889_v19 = vadd.f32 %v888_v17, %v4780_v6 }
  0xf5   :  { %3772 = vmatmul.mubr.msk.bf16.gmra.mrb[116].mxu0 %vm378_vm0, %v4416_v0  ;;  %3804 = vmatmul.mubr.msk.bf16.gmra.mrb[116].mxu1 %vm378_vm0, %v4416_v0 }
  0xf6   :  { %3439 = vst [vmem:[#allocation2 + $0x80] sm:$0xff] %v4143_v14  ;;  %v4147_v20 = vpack.c.bf16 %v536_v16, %v534_v11  ;;  %807 = vmatprep.mubr.bf16.mxu0 %v4467_v8  ;;  %3440 = vst [vmem:[#allocation2 + $0x88] sm:$0xff] %v4144_v18  ;;  %v4148_v21 = vpack.c.bf16 %v889_v19, %v887_v15  ;;  %1160 = vmatprep.mubr.bf16.mxu1 %v4467_v8 }
  0xf8   :  { %3443 = vst [vmem:[#allocation2 + $0xa0] sm:$0xff] %v4147_v20  ;;  %v539_v22 = vpop.f32.mrb[12].mxu0  ;;  %3444 = vst [vmem:[#allocation2 + $0xa8] sm:$0xff] %v4148_v21  ;;  %v892_v25 = vpop.f32.mrb[12].mxu1 }
  0xf9   :  { %v540_v24 = vadd.f32 %v539_v22, %v4772_v3  ;;  %v541_v27 = vpop.f32.mrb[13].mxu0  ;;  %v893_v29 = vadd.f32 %v892_v25, %v4775_v4  ;;  %v894_v31 = vpop.f32.mrb[13].mxu1 }
  0xfa   :  { %v542_v30 = vadd.f32 %v541_v27, %v4777_v5  ;;  %v543_v32 = vpop.f32.mrb[14].mxu0  ;;  %v895_v34 = vadd.f32 %v894_v31, %v4780_v6  ;;  %v896_v42 = vpop.f32.mrb[14].mxu1 }
  0xfb   :  { %v544_v35 = vadd.f32 %v543_v32, %v4772_v3  ;;  %v545_v43 = vpop.f32.mrb[15].mxu0  ;;  %v897_v45 = vadd.f32 %v896_v42, %v4775_v4  ;;  %v898_v47 = vpop.f32.mrb[15].mxu1 }
  0xfc   :  { %v4151_v44 = vpack.c.bf16 %v542_v30, %v540_v24  ;;  %v546_v46 = vadd.f32 %v545_v43, %v4777_v5  ;;  %v4152_v48 = vpack.c.bf16 %v895_v34, %v893_v29  ;;  %v899_v49 = vadd.f32 %v898_v47, %v4780_v6 }
  0xfd   :  { %3773 = vmatmul.mubr.msk.bf16.gmra.mrb[120].mxu0 %vm378_vm0, %v4417_v28  ;;  %3805 = vmatmul.mubr.msk.bf16.gmra.mrb[120].mxu1 %vm378_vm0, %v4417_v28 }
  0xfe   :  { %3447 = vst [vmem:[#allocation2 + $0xc0] sm:$0xff] %v4151_v44  ;;  %v4155_v50 = vpack.c.bf16 %v546_v46, %v544_v35  ;;  %817 = vmatprep.mubr.bf16.mxu0 %v4467_v8  ;;  %3448 = vst [vmem:[#allocation2 + $0xc8] sm:$0xff] %v4152_v48  ;;  %v4156_v51 = vpack.c.bf16 %v899_v49, %v897_v45  ;;  %1170 = vmatprep.mubr.bf16.mxu1 %v4467_v8 }
 0x100   :  { %3451 = vst [vmem:[#allocation2 + $0xe0] sm:$0xff] %v4155_v50  ;;  %v549_v52 = vpop.f32.mrb[16].mxu0  ;;  %3452 = vst [vmem:[#allocation2 + $0xe8] sm:$0xff] %v4156_v51  ;;  %v902_v54 = vpop.f32.mrb[16].mxu1 }
 0x101   :  { %v550_v53 = vadd.f32 %v549_v52, %v4772_v3  ;;  %v551_v55 = vpop.f32.mrb[17].mxu0  ;;  %v903_v57 = vadd.f32 %v902_v54, %v4775_v4  ;;  %v904_v59 = vpop.f32.mrb[17].mxu1 }
 0x102   :  { %v552_v58 = vadd.f32 %v551_v55, %v4777_v5  ;;  %v553_v61 = vpop.f32.mrb[18].mxu0  ;;  %v905_v62 = vadd.f32 %v904_v59, %v4780_v6  ;;  %v906_v0 = vpop.f32.mrb[18].mxu1 }
 0x103   :  { %v554_v63 = vadd.f32 %v553_v61, %v4772_v3  ;;  %v555_v1 = vpop.f32.mrb[19].mxu0  ;;  %v907_v7 = vadd.f32 %v906_v0, %v4775_v4  ;;  %v908_v10 = vpop.f32.mrb[19].mxu1 }
 0x104   :  { %v4159_v2 = vpack.c.bf16 %v552_v58, %v550_v53  ;;  %v556_v9 = vadd.f32 %v555_v1, %v4777_v5  ;;  %v4160_v11 = vpack.c.bf16 %v905_v62, %v903_v57  ;;  %v909_v12 = vadd.f32 %v908_v10, %v4780_v6 }
 0x105   :  { %3774 = vmatmul.mubr.msk.bf16.gmra.mrb[124].mxu0 %vm378_vm0, %v4418_v56  ;;  %3806 = vmatmul.mubr.msk.bf16.gmra.mrb[124].mxu1 %vm378_vm0, %v4418_v56 }
 0x106   :  { %3455 = vst [vmem:[#allocation2 + $0x100] sm:$0xff] %v4159_v2  ;;  %v4163_v13 = vpack.c.bf16 %v556_v9, %v554_v63  ;;  %1213 = vmatprep.mubr.bf16.mxu0 %v4467_v8  ;;  %3456 = vst [vmem:[#allocation2 + $0x108] sm:$0xff] %v4160_v11  ;;  %v4164_v14 = vpack.c.bf16 %v909_v12, %v907_v7  ;;  %1566 = vmatprep.mubr.bf16.mxu1 %v4467_v8 }
 0x108   :  { %3459 = vst [vmem:[#allocation2 + $0x120] sm:$0xff] %v4163_v13  ;;  %v559_v15 = vpop.f32.mrb[20].mxu0  ;;  %3460 = vst [vmem:[#allocation2 + $0x128] sm:$0xff] %v4164_v14  ;;  %v912_v17 = vpop.f32.mrb[20].mxu1 }
 0x109   :  { %v560_v16 = vadd.f32 %v559_v15, %v4772_v3  ;;  %v561_v18 = vpop.f32.mrb[21].mxu0  ;;  %v913_v19 = vadd.f32 %v912_v17, %v4775_v4  ;;  %v914_v21 = vpop.f32.mrb[21].mxu1 }
 0x10a   :  { %v562_v20 = vadd.f32 %v561_v18, %v4777_v5  ;;  %v563_v22 = vpop.f32.mrb[22].mxu0  ;;  %v915_v24 = vadd.f32 %v914_v21, %v4780_v6  ;;  %v916_v27 = vpop.f32.mrb[22].mxu1 }
 0x10b   :  { %v564_v25 = vadd.f32 %v563_v22, %v4772_v3  ;;  %v565_v28 = vpop.f32.mrb[23].mxu0  ;;  %v917_v30 = vadd.f32 %v916_v27, %v4775_v4  ;;  %v918_v32 = vpop.f32.mrb[23].mxu1 }
 0x10c   :  { %v4167_v29 = vpack.c.bf16 %v562_v20, %v560_v16  ;;  %v566_v31 = vadd.f32 %v565_v28, %v4777_v5  ;;  %v4168_v34 = vpack.c.bf16 %v915_v24, %v913_v19  ;;  %v919_v35 = vadd.f32 %v918_v32, %v4780_v6 }
 0x10d   :  { %3807 = vmatmul.mubr.msk.bf16.vlgmr.msra.gmra.mrb[128].mxu0 %vm378_vm0, %v4532_v23  ;;  %3839 = vmatmul.mubr.msk.bf16.vlgmr.msra.gmra.mrb[128].mxu1 %vm378_vm0, %v4532_v23 }
 0x10e   :  { %3463 = vst [vmem:[#allocation2 + $0x140] sm:$0xff] %v4167_v29  ;;  %v4171_v42 = vpack.c.bf16 %v566_v31, %v564_v25  ;;  %1223 = vmatprep.mubr.bf16.mxu0 %v4467_v8  ;;  %3464 = vst [vmem:[#allocation2 + $0x148] sm:$0xff] %v4168_v34  ;;  %v4172_v43 = vpack.c.bf16 %v919_v35, %v917_v30  ;;  %1576 = vmatprep.mubr.bf16.mxu1 %v4467_v8 }
 0x110   :  { %3467 = vst [vmem:[#allocation2 + $0x160] sm:$0xff] %v4171_v42  ;;  %v569_v44 = vpop.f32.mrb[24].mxu0  ;;  %3468 = vst [vmem:[#allocation2 + $0x168] sm:$0xff] %v4172_v43  ;;  %v922_v46 = vpop.f32.mrb[24].mxu1 }
 0x111   :  { %v570_v45 = vadd.f32 %v569_v44, %v4772_v3  ;;  %v571_v47 = vpop.f32.mrb[25].mxu0  ;;  %v923_v48 = vadd.f32 %v922_v46, %v4775_v4  ;;  %v924_v50 = vpop.f32.mrb[25].mxu1 }
 0x112   :  { %v572_v49 = vadd.f32 %v571_v47, %v4777_v5  ;;  %v573_v51 = vpop.f32.mrb[26].mxu0  ;;  %v925_v23 = vadd.f32 %v924_v50, %v4780_v6  ;;  %v926_v53 = vpop.f32.mrb[26].mxu1 }
 0x113   :  { %v574_v52 = vadd.f32 %v573_v51, %v4772_v3  ;;  %v575_v54 = vpop.f32.mrb[27].mxu0  ;;  %v927_v56 = vadd.f32 %v926_v53, %v4775_v4  ;;  %v928_v58 = vpop.f32.mrb[27].mxu1 }
 0x114   :  { %v4175_v55 = vpack.c.bf16 %v572_v49, %v570_v45  ;;  %v576_v57 = vadd.f32 %v575_v54, %v4777_v5  ;;  %v4176_v59 = vpack.c.bf16 %v925_v23, %v923_v48  ;;  %v929_v61 = vadd.f32 %v928_v58, %v4780_v6 }
 0x115   :  { %3808 = vmatmul.mubr.msk.bf16.gmra.mrb[132].mxu0 %vm378_vm0, %v4543_v26  ;;  %3840 = vmatmul.mubr.msk.bf16.gmra.mrb[132].mxu1 %vm378_vm0, %v4543_v26 }
 0x116   :  { %3471 = vst [vmem:[#allocation2 + $0x180] sm:$0xff] %v4175_v55  ;;  %v4179_v62 = vpack.c.bf16 %v576_v57, %v574_v52  ;;  %1233 = vmatprep.mubr.bf16.mxu0 %v4467_v8  ;;  %3472 = vst [vmem:[#allocation2 + $0x188] sm:$0xff] %v4176_v59  ;;  %v4180_v63 = vpack.c.bf16 %v929_v61, %v927_v56  ;;  %1586 = vmatprep.mubr.bf16.mxu1 %v4467_v8 }
 0x118   :  { %3475 = vst [vmem:[#allocation2 + $0x1a0] sm:$0xff] %v4179_v62  ;;  %v579_v0 = vpop.f32.mrb[28].mxu0  ;;  %3476 = vst [vmem:[#allocation2 + $0x1a8] sm:$0xff] %v4180_v63  ;;  %v932_v2 = vpop.f32.mrb[28].mxu1 }
 0x119   :  { %v580_v1 = vadd.f32 %v579_v0, %v4772_v3  ;;  %v581_v7 = vpop.f32.mrb[29].mxu0  ;;  %v933_v9 = vadd.f32 %v932_v2, %v4775_v4  ;;  %v934_v11 = vpop.f32.mrb[29].mxu1 }
 0x11a   :  { %v582_v10 = vadd.f32 %v581_v7, %v4777_v5  ;;  %v583_v12 = vpop.f32.mrb[30].mxu0  ;;  %v935_v26 = vadd.f32 %v934_v11, %v4780_v6  ;;  %v936_v14 = vpop.f32.mrb[30].mxu1 }
 0x11b   :  { %v584_v13 = vadd.f32 %v583_v12, %v4772_v3  ;;  %v585_v15 = vpop.f32.mrb[31].mxu0  ;;  %v937_v17 = vadd.f32 %v936_v14, %v4775_v4  ;;  %v938_v19 = vpop.f32.mrb[31].mxu1 }
 0x11c   :  { %v4183_v16 = vpack.c.bf16 %v582_v10, %v580_v1  ;;  %v586_v18 = vadd.f32 %v585_v15, %v4777_v5  ;;  %v4184_v20 = vpack.c.bf16 %v935_v26, %v933_v9  ;;  %v939_v21 = vadd.f32 %v938_v19, %v4780_v6 }
 0x11d   :  { %3809 = vmatmul.mubr.msk.bf16.gmra.mrb[136].mxu0 %vm378_vm0, %v4566_v33  ;;  %3841 = vmatmul.mubr.msk.bf16.gmra.mrb[136].mxu1 %vm378_vm0, %v4566_v33 }
 0x11e   :  { %3479 = vst [vmem:[#allocation2 + $0x1c0] sm:$0xff] %v4183_v16  ;;  %v4187_v22 = vpack.c.bf16 %v586_v18, %v584_v13  ;;  %1243 = vmatprep.mubr.bf16.mxu0 %v4467_v8  ;;  %3480 = vst [vmem:[#allocation2 + $0x1c8] sm:$0xff] %v4184_v20  ;;  %v4188_v24 = vpack.c.bf16 %v939_v21, %v937_v17  ;;  %1596 = vmatprep.mubr.bf16.mxu1 %v4467_v8 }
 0x120   :  { %3483 = vst [vmem:[#allocation2 + $0x1e0] sm:$0xff] %v4187_v22  ;;  %v589_v25 = vpop.f32.mrb[32].mxu0  ;;  %3484 = vst [vmem:[#allocation2 + $0x1e8] sm:$0xff] %v4188_v24  ;;  %v942_v28 = vpop.f32.mrb[32].mxu1 }
 0x121   :  { %v590_v27 = vadd.f32 %v589_v25, %v4772_v3  ;;  %v591_v29 = vpop.f32.mrb[33].mxu0  ;;  %v943_v30 = vadd.f32 %v942_v28, %v4775_v4  ;;  %v944_v32 = vpop.f32.mrb[33].mxu1 }
 0x122   :  { %v592_v31 = vadd.f32 %v591_v29, %v4777_v5  ;;  %v593_v34 = vpop.f32.mrb[34].mxu0  ;;  %v945_v33 = vadd.f32 %v944_v32, %v4780_v6  ;;  %v946_v42 = vpop.f32.mrb[34].mxu1 }
 0x123   :  { %v594_v35 = vadd.f32 %v593_v34, %v4772_v3  ;;  %v595_v43 = vpop.f32.mrb[35].mxu0  ;;  %v947_v45 = vadd.f32 %v946_v42, %v4775_v4  ;;  %v948_v47 = vpop.f32.mrb[35].mxu1 }
 0x124   :  { %v4191_v44 = vpack.c.bf16 %v592_v31, %v590_v27  ;;  %v596_v46 = vadd.f32 %v595_v43, %v4777_v5  ;;  %v4192_v48 = vpack.c.bf16 %v945_v33, %v943_v30  ;;  %v949_v49 = vadd.f32 %v948_v47, %v4780_v6 }
 0x125   :  { %3810 = vmatmul.mubr.msk.bf16.gmra.mrb[140].mxu0 %vm378_vm0, %v4577_v36  ;;  %3842 = vmatmul.mubr.msk.bf16.gmra.mrb[140].mxu1 %vm378_vm0, %v4577_v36 }
 0x126   :  { %3487 = vst [vmem:[#allocation2 + $0x200] sm:$0xff] %v4191_v44  ;;  %v4195_v50 = vpack.c.bf16 %v596_v46, %v594_v35  ;;  %1253 = vmatprep.mubr.bf16.mxu0 %v4467_v8  ;;  %3488 = vst [vmem:[#allocation2 + $0x208] sm:$0xff] %v4192_v48  ;;  %v4196_v51 = vpack.c.bf16 %v949_v49, %v947_v45  ;;  %1606 = vmatprep.mubr.bf16.mxu1 %v4467_v8 }
 0x128   :  { %3491 = vst [vmem:[#allocation2 + $0x220] sm:$0xff] %v4195_v50  ;;  %v599_v23 = vpop.f32.mrb[36].mxu0  ;;  %3492 = vst [vmem:[#allocation2 + $0x228] sm:$0xff] %v4196_v51  ;;  %v952_v53 = vpop.f32.mrb[36].mxu1 }
 0x129   :  { %v600_v52 = vadd.f32 %v599_v23, %v4772_v3  ;;  %v601_v54 = vpop.f32.mrb[37].mxu0  ;;  %v953_v55 = vadd.f32 %v952_v53, %v4775_v4  ;;  %v954_v57 = vpop.f32.mrb[37].mxu1 }
 0x12a   :  { %v602_v56 = vadd.f32 %v601_v54, %v4777_v5  ;;  %v603_v58 = vpop.f32.mrb[38].mxu0  ;;  %v955_v36 = vadd.f32 %v954_v57, %v4780_v6  ;;  %v956_v61 = vpop.f32.mrb[38].mxu1 }
 0x12b   :  { %v604_v59 = vadd.f32 %v603_v58, %v4772_v3  ;;  %v605_v62 = vpop.f32.mrb[39].mxu0  ;;  %v957_v0 = vadd.f32 %v956_v61, %v4775_v4  ;;  %v958_v2 = vpop.f32.mrb[39].mxu1 }
 0x12c   :  { %v4199_v63 = vpack.c.bf16 %v602_v56, %v600_v52  ;;  %v606_v1 = vadd.f32 %v605_v62, %v4777_v5  ;;  %v4200_v7 = vpack.c.bf16 %v955_v36, %v953_v55  ;;  %v959_v9 = vadd.f32 %v958_v2, %v4780_v6 }
 0x12d   :  { %3811 = vmatmul.mubr.msk.bf16.gmra.mrb[144].mxu0 %vm378_vm0, %v4588_v37  ;;  %3843 = vmatmul.mubr.msk.bf16.gmra.mrb[144].mxu1 %vm378_vm0, %v4588_v37 }
 0x12e   :  { %3495 = vst [vmem:[#allocation2 + $0x240] sm:$0xff] %v4199_v63  ;;  %v4203_v10 = vpack.c.bf16 %v606_v1, %v604_v59  ;;  %1263 = vmatprep.mubr.bf16.mxu0 %v4467_v8  ;;  %3496 = vst [vmem:[#allocation2 + $0x248] sm:$0xff] %v4200_v7  ;;  %v4204_v11 = vpack.c.bf16 %v959_v9, %v957_v0  ;;  %1616 = vmatprep.mubr.bf16.mxu1 %v4467_v8 }
 0x130   :  { %3499 = vst [vmem:[#allocation2 + $0x260] sm:$0xff] %v4203_v10  ;;  %v609_v12 = vpop.f32.mrb[40].mxu0  ;;  %3500 = vst [vmem:[#allocation2 + $0x268] sm:$0xff] %v4204_v11  ;;  %v962_v13 = vpop.f32.mrb[40].mxu1 }
 0x131   :  { %v610_v26 = vadd.f32 %v609_v12, %v4772_v3  ;;  %v611_v14 = vpop.f32.mrb[41].mxu0  ;;  %v963_v15 = vadd.f32 %v962_v13, %v4775_v4  ;;  %v964_v17 = vpop.f32.mrb[41].mxu1 }
 0x132   :  { %v612_v16 = vadd.f32 %v611_v14, %v4777_v5  ;;  %v613_v18 = vpop.f32.mrb[42].mxu0  ;;  %v965_v37 = vadd.f32 %v964_v17, %v4780_v6  ;;  %v966_v20 = vpop.f32.mrb[42].mxu1 }
 0x133   :  { %v614_v19 = vadd.f32 %v613_v18, %v4772_v3  ;;  %v615_v21 = vpop.f32.mrb[43].mxu0  ;;  %v967_v24 = vadd.f32 %v966_v20, %v4775_v4  ;;  %v968_v27 = vpop.f32.mrb[43].mxu1 }
 0x134   :  { %v4207_v22 = vpack.c.bf16 %v612_v16, %v610_v26  ;;  %v616_v25 = vadd.f32 %v615_v21, %v4777_v5  ;;  %v4208_v28 = vpack.c.bf16 %v965_v37, %v963_v15  ;;  %v969_v29 = vadd.f32 %v968_v27, %v4780_v6 }
 0x135   :  { %3812 = vmatmul.mubr.msk.bf16.gmra.mrb[148].mxu0 %vm378_vm0, %v4599_v38  ;;  %3844 = vmatmul.mubr.msk.bf16.gmra.mrb[148].mxu1 %vm378_vm0, %v4599_v38 }
 0x136   :  { %3503 = vst [vmem:[#allocation2 + $0x280] sm:$0xff] %v4207_v22  ;;  %v4211_v30 = vpack.c.bf16 %v616_v25, %v614_v19  ;;  %1273 = vmatprep.mubr.bf16.mxu0 %v4467_v8  ;;  %3504 = vst [vmem:[#allocation2 + $0x288] sm:$0xff] %v4208_v28  ;;  %v4212_v31 = vpack.c.bf16 %v969_v29, %v967_v24  ;;  %1626 = vmatprep.mubr.bf16.mxu1 %v4467_v8 }
 0x138   :  { %3507 = vst [vmem:[#allocation2 + $0x2a0] sm:$0xff] %v4211_v30  ;;  %v619_v32 = vpop.f32.mrb[44].mxu0  ;;  %3508 = vst [vmem:[#allocation2 + $0x2a8] sm:$0xff] %v4212_v31  ;;  %v972_v33 = vpop.f32.mrb[44].mxu1 }
 0x139   :  { %v620_v34 = vadd.f32 %v619_v32, %v4772_v3  ;;  %v621_v35 = vpop.f32.mrb[45].mxu0  ;;  %v973_v42 = vadd.f32 %v972_v33, %v4775_v4  ;;  %v974_v44 = vpop.f32.mrb[45].mxu1 }
 0x13a   :  { %v622_v43 = vadd.f32 %v621_v35, %v4777_v5  ;;  %v623_v45 = vpop.f32.mrb[46].mxu0  ;;  %v975_v38 = vadd.f32 %v974_v44, %v4780_v6  ;;  %v976_v47 = vpop.f32.mrb[46].mxu1 }
 0x13b   :  { %v624_v46 = vadd.f32 %v623_v45, %v4772_v3  ;;  %v625_v48 = vpop.f32.mrb[47].mxu0  ;;  %v977_v50 = vadd.f32 %v976_v47, %v4775_v4  ;;  %v978_v23 = vpop.f32.mrb[47].mxu1 }
 0x13c   :  { %v4215_v49 = vpack.c.bf16 %v622_v43, %v620_v34  ;;  %v626_v51 = vadd.f32 %v625_v48, %v4777_v5  ;;  %v4216_v52 = vpack.c.bf16 %v975_v38, %v973_v42  ;;  %v979_v53 = vadd.f32 %v978_v23, %v4780_v6 }
 0x13d   :  { %3813 = vmatmul.mubr.msk.bf16.gmra.mrb[152].mxu0 %vm378_vm0, %v4610_v39  ;;  %3845 = vmatmul.mubr.msk.bf16.gmra.mrb[152].mxu1 %vm378_vm0, %v4610_v39 }
 0x13e   :  { %3511 = vst [vmem:[#allocation2 + $0x2c0] sm:$0xff] %v4215_v49  ;;  %v4219_v54 = vpack.c.bf16 %v626_v51, %v624_v46  ;;  %1283 = vmatprep.mubr.bf16.mxu0 %v4467_v8  ;;  %3512 = vst [vmem:[#allocation2 + $0x2c8] sm:$0xff] %v4216_v52  ;;  %v4220_v55 = vpack.c.bf16 %v979_v53, %v977_v50  ;;  %1636 = vmatprep.mubr.bf16.mxu1 %v4467_v8 }
 0x140   :  { %3515 = vst [vmem:[#allocation2 + $0x2e0] sm:$0xff] %v4219_v54  ;;  %v629_v56 = vpop.f32.mrb[48].mxu0  ;;  %3516 = vst [vmem:[#allocation2 + $0x2e8] sm:$0xff] %v4220_v55  ;;  %v982_v58 = vpop.f32.mrb[48].mxu1 }
 0x141   :  { %v630_v57 = vadd.f32 %v629_v56, %v4772_v3  ;;  %v631_v36 = vpop.f32.mrb[49].mxu0  ;;  %v983_v59 = vadd.f32 %v982_v58, %v4775_v4  ;;  %v984_v62 = vpop.f32.mrb[49].mxu1  ;;  %v4419_v56 = vld [vmem:[%s5570_s0 + $0x48] sm:$0xff]  }
 0x142   :  { %v632_v61 = vadd.f32 %v631_v36, %v4777_v5  ;;  %v633_v63 = vpop.f32.mrb[50].mxu0  ;;  %v985_v39 = vadd.f32 %v984_v62, %v4780_v6  ;;  %v986_v1 = vpop.f32.mrb[50].mxu1 }
 0x143   :  { %v634_v0 = vadd.f32 %v633_v63, %v4772_v3  ;;  %v635_v2 = vpop.f32.mrb[51].mxu0  ;;  %v987_v9 = vadd.f32 %v986_v1, %v4775_v4  ;;  %v988_v11 = vpop.f32.mrb[51].mxu1 }
 0x144   :  { %v4223_v7 = vpack.c.bf16 %v632_v61, %v630_v57  ;;  %v636_v10 = vadd.f32 %v635_v2, %v4777_v5  ;;  %v4224_v12 = vpack.c.bf16 %v985_v39, %v983_v59  ;;  %v989_v26 = vadd.f32 %v988_v11, %v4780_v6 }
 0x145   :  { %3814 = vmatmul.mubr.msk.bf16.gmra.mrb[156].mxu0 %vm378_vm0, %v4621_v40  ;;  %3846 = vmatmul.mubr.msk.bf16.gmra.mrb[156].mxu1 %vm378_vm0, %v4621_v40 }
 0x146   :  { %3519 = vst [vmem:[#allocation2 + $0x300] sm:$0xff] %v4223_v7  ;;  %v4227_v13 = vpack.c.bf16 %v636_v10, %v634_v0  ;;  %1293 = vmatprep.mubr.bf16.mxu0 %v4467_v8  ;;  %3520 = vst [vmem:[#allocation2 + $0x308] sm:$0xff] %v4224_v12  ;;  %v4228_v14 = vpack.c.bf16 %v989_v26, %v987_v9  ;;  %1646 = vmatprep.mubr.bf16.mxu1 %v4467_v8 }
 0x148   :  { %3523 = vst [vmem:[#allocation2 + $0x320] sm:$0xff] %v4227_v13  ;;  %v639_v15 = vpop.f32.mrb[52].mxu0  ;;  %3524 = vst [vmem:[#allocation2 + $0x328] sm:$0xff] %v4228_v14  ;;  %v992_v17 = vpop.f32.mrb[52].mxu1 }
 0x149   :  { %v640_v16 = vadd.f32 %v639_v15, %v4772_v3  ;;  %v641_v18 = vpop.f32.mrb[53].mxu0  ;;  %v993_v37 = vadd.f32 %v992_v17, %v4775_v4  ;;  %v994_v20 = vpop.f32.mrb[53].mxu1 }
 0x14a   :  { %v642_v19 = vadd.f32 %v641_v18, %v4777_v5  ;;  %v643_v21 = vpop.f32.mrb[54].mxu0  ;;  %v995_v40 = vadd.f32 %v994_v20, %v4780_v6  ;;  %v996_v24 = vpop.f32.mrb[54].mxu1 }
 0x14b   :  { %v644_v22 = vadd.f32 %v643_v21, %v4772_v3  ;;  %v645_v25 = vpop.f32.mrb[55].mxu0  ;;  %v997_v28 = vadd.f32 %v996_v24, %v4775_v4  ;;  %v998_v30 = vpop.f32.mrb[55].mxu1 }
 0x14c   :  { %v4231_v27 = vpack.c.bf16 %v642_v19, %v640_v16  ;;  %v646_v29 = vadd.f32 %v645_v25, %v4777_v5  ;;  %v4232_v31 = vpack.c.bf16 %v995_v40, %v993_v37  ;;  %v999_v32 = vadd.f32 %v998_v30, %v4780_v6  ;;  %v4420_v16 = vld [vmem:[%s5570_s0 + $0x50] sm:$0xff]  }
 0x14d   :  { %3815 = vmatmul.mubr.msk.bf16.gmra.mrb[160].mxu0 %vm378_vm0, %v4632_v41  ;;  %3847 = vmatmul.mubr.msk.bf16.gmra.mrb[160].mxu1 %vm378_vm0, %v4632_v41 }
 0x14e   :  { %3527 = vst [vmem:[#allocation2 + $0x340] sm:$0xff] %v4231_v27  ;;  %v4235_v34 = vpack.c.bf16 %v646_v29, %v644_v22  ;;  %1303 = vmatprep.mubr.bf16.mxu0 %v4467_v8  ;;  %3528 = vst [vmem:[#allocation2 + $0x348] sm:$0xff] %v4232_v31  ;;  %v4236_v33 = vpack.c.bf16 %v999_v32, %v997_v28  ;;  %1656 = vmatprep.mubr.bf16.mxu1 %v4467_v8 }
 0x150   :  { %3531 = vst [vmem:[#allocation2 + $0x360] sm:$0xff] %v4235_v34  ;;  %v649_v35 = vpop.f32.mrb[56].mxu0  ;;  %3532 = vst [vmem:[#allocation2 + $0x368] sm:$0xff] %v4236_v33  ;;  %v1002_v43 = vpop.f32.mrb[56].mxu1 }
 0x151   :  { %v650_v42 = vadd.f32 %v649_v35, %v4772_v3  ;;  %v651_v44 = vpop.f32.mrb[57].mxu0  ;;  %v1003_v45 = vadd.f32 %v1002_v43, %v4775_v4  ;;  %v1004_v46 = vpop.f32.mrb[57].mxu1  ;;  %v4421_v43 = vld [vmem:[%s5570_s0 + $0x58] sm:$0xff]  }
 0x152   :  { %v652_v38 = vadd.f32 %v651_v44, %v4777_v5  ;;  %v653_v47 = vpop.f32.mrb[58].mxu0  ;;  %v1005_v41 = vadd.f32 %v1004_v46, %v4780_v6  ;;  %v1006_v49 = vpop.f32.mrb[58].mxu1 }
 0x153   :  { %v654_v48 = vadd.f32 %v653_v47, %v4772_v3  ;;  %v655_v50 = vpop.f32.mrb[59].mxu0  ;;  %v1007_v23 = vadd.f32 %v1006_v49, %v4775_v4  ;;  %v1008_v53 = vpop.f32.mrb[59].mxu1 }
 0x154   :  { %v4239_v51 = vpack.c.bf16 %v652_v38, %v650_v42  ;;  %v656_v52 = vadd.f32 %v655_v50, %v4777_v5  ;;  %v4240_v54 = vpack.c.bf16 %v1005_v41, %v1003_v45  ;;  %v1009_v55 = vadd.f32 %v1008_v53, %v4780_v6 }
 0x155   :  { %3816 = vmatmul.mubr.msk.bf16.gmra.mrb[164].mxu0 %vm378_vm0, %v4419_v56  ;;  %3848 = vmatmul.mubr.msk.bf16.gmra.mrb[164].mxu1 %vm378_vm0, %v4419_v56 }
 0x156   :  { %3535 = vst [vmem:[#allocation2 + $0x380] sm:$0xff] %v4239_v51  ;;  %v4243_v57 = vpack.c.bf16 %v656_v52, %v654_v48  ;;  %1313 = vmatprep.mubr.bf16.mxu0 %v4467_v8  ;;  %3536 = vst [vmem:[#allocation2 + $0x388] sm:$0xff] %v4240_v54  ;;  %v4244_v58 = vpack.c.bf16 %v1009_v55, %v1007_v23  ;;  %1666 = vmatprep.mubr.bf16.mxu1 %v4467_v8 }
 0x158   :  { %3539 = vst [vmem:[#allocation2 + $0x3a0] sm:$0xff] %v4243_v57  ;;  %v659_v36 = vpop.f32.mrb[60].mxu0  ;;  %3540 = vst [vmem:[#allocation2 + $0x3a8] sm:$0xff] %v4244_v58  ;;  %v1012_v61 = vpop.f32.mrb[60].mxu1 }
 0x159   :  { %v660_v59 = vadd.f32 %v659_v36, %v4772_v3  ;;  %v661_v62 = vpop.f32.mrb[61].mxu0  ;;  %v1013_v63 = vadd.f32 %v1012_v61, %v4775_v4  ;;  %v1014_v0 = vpop.f32.mrb[61].mxu1  ;;  %v4422_v61 = vld [vmem:[%s5570_s0 + $0x60] sm:$0xff]  }
 0x15a   :  { %v662_v39 = vadd.f32 %v661_v62, %v4777_v5  ;;  %v663_v1 = vpop.f32.mrb[62].mxu0  ;;  %v1015_v2 = vadd.f32 %v1014_v0, %v4780_v6  ;;  %v1016_v9 = vpop.f32.mrb[62].mxu1 }
 0x15b   :  { %v664_v7 = vadd.f32 %v663_v1, %v4772_v3  ;;  %v665_v10 = vpop.f32.mrb[63].mxu0  ;;  %v1017_v12 = vadd.f32 %v1016_v9, %v4775_v4  ;;  %v1018_v13 = vpop.f32.mrb[63].mxu1 }
 0x15c   :  { %v4247_v11 = vpack.c.bf16 %v662_v39, %v660_v59  ;;  %v666_v26 = vadd.f32 %v665_v10, %v4777_v5  ;;  %v4248_v14 = vpack.c.bf16 %v1015_v2, %v1013_v63  ;;  %v1019_v15 = vadd.f32 %v1018_v13, %v4780_v6 }
 0x15d   :  { %3817 = vmatmul.mubr.msk.bf16.gmra.mrb[168].mxu0 %vm378_vm0, %v4420_v16  ;;  %3849 = vmatmul.mubr.msk.bf16.gmra.mrb[168].mxu1 %vm378_vm0, %v4420_v16 }
 0x15e   :  { %3543 = vst [vmem:[#allocation2 + $0x3c0] sm:$0xff] %v4247_v11  ;;  %v4251_v17 = vpack.c.bf16 %v666_v26, %v664_v7  ;;  %1323 = vmatprep.mubr.bf16.mxu0 %v4467_v8  ;;  %3544 = vst [vmem:[#allocation2 + $0x3c8] sm:$0xff] %v4248_v14  ;;  %v4252_v18 = vpack.c.bf16 %v1019_v15, %v1017_v12  ;;  %1676 = vmatprep.mubr.bf16.mxu1 %v4467_v8 }
 0x160   :  { %3547 = vst [vmem:[#allocation2 + $0x3e0] sm:$0xff] %v4251_v17  ;;  %v669_v37 = vpop.f32.mrb[64].mxu0  ;;  %3548 = vst [vmem:[#allocation2 + $0x3e8] sm:$0xff] %v4252_v18  ;;  %v1022_v20 = vpop.f32.mrb[64].mxu1 }
 0x161   :  { %v670_v19 = vadd.f32 %v669_v37, %v4772_v3  ;;  %v671_v21 = vpop.f32.mrb[65].mxu0  ;;  %v1023_v40 = vadd.f32 %v1022_v20, %v4775_v4  ;;  %v1024_v24 = vpop.f32.mrb[65].mxu1  ;;  %v4423_v20 = vld [vmem:[%s5570_s0 + $0x68] sm:$0xff]  }
 0x162   :  { %v672_v22 = vadd.f32 %v671_v21, %v4777_v5  ;;  %v673_v25 = vpop.f32.mrb[66].mxu0  ;;  %v1025_v27 = vadd.f32 %v1024_v24, %v4780_v6  ;;  %v1026_v29 = vpop.f32.mrb[66].mxu1 }
 0x163   :  { %v674_v28 = vadd.f32 %v673_v25, %v4772_v3  ;;  %v675_v30 = vpop.f32.mrb[67].mxu0  ;;  %v1027_v32 = vadd.f32 %v1026_v29, %v4775_v4  ;;  %v1028_v33 = vpop.f32.mrb[67].mxu1 }
 0x164   :  { %v4255_v31 = vpack.c.bf16 %v672_v22, %v670_v19  ;;  %v676_v34 = vadd.f32 %v675_v30, %v4777_v5  ;;  %v4256_v35 = vpack.c.bf16 %v1025_v27, %v1023_v40  ;;  %v1029_v42 = vadd.f32 %v1028_v33, %v4780_v6 }
 0x165   :  { %3818 = vmatmul.mubr.msk.bf16.gmra.mrb[172].mxu0 %vm378_vm0, %v4421_v43  ;;  %3850 = vmatmul.mubr.msk.bf16.gmra.mrb[172].mxu1 %vm378_vm0, %v4421_v43 }
 0x166   :  { %3551 = vst [vmem:[#allocation2 + $0x400] sm:$0xff] %v4255_v31  ;;  %v4259_v44 = vpack.c.bf16 %v676_v34, %v674_v28  ;;  %1333 = vmatprep.mubr.bf16.mxu0 %v4467_v8  ;;  %3552 = vst [vmem:[#allocation2 + $0x408] sm:$0xff] %v4256_v35  ;;  %v4260_v45 = vpack.c.bf16 %v1029_v42, %v1027_v32  ;;  %1686 = vmatprep.mubr.bf16.mxu1 %v4467_v8 }
 0x168   :  { %3555 = vst [vmem:[#allocation2 + $0x420] sm:$0xff] %v4259_v44  ;;  %v679_v38 = vpop.f32.mrb[68].mxu0  ;;  %3556 = vst [vmem:[#allocation2 + $0x428] sm:$0xff] %v4260_v45  ;;  %v1032_v47 = vpop.f32.mrb[68].mxu1 }
 0x169   :  { %v680_v46 = vadd.f32 %v679_v38, %v4772_v3  ;;  %v681_v41 = vpop.f32.mrb[69].mxu0  ;;  %v1033_v48 = vadd.f32 %v1032_v47, %v4775_v4  ;;  %v1034_v50 = vpop.f32.mrb[69].mxu1  ;;  %v4424_v47 = vld [vmem:[%s5570_s0 + $0x70] sm:$0xff]  }
 0x16a   :  { %v682_v49 = vadd.f32 %v681_v41, %v4777_v5  ;;  %v683_v51 = vpop.f32.mrb[70].mxu0  ;;  %v1035_v23 = vadd.f32 %v1034_v50, %v4780_v6  ;;  %v1036_v53 = vpop.f32.mrb[70].mxu1 }
 0x16b   :  { %v684_v52 = vadd.f32 %v683_v51, %v4772_v3  ;;  %v685_v54 = vpop.f32.mrb[71].mxu0  ;;  %v1037_v56 = vadd.f32 %v1036_v53, %v4775_v4  ;;  %v1038_v58 = vpop.f32.mrb[71].mxu1 }
 0x16c   :  { %v4263_v55 = vpack.c.bf16 %v682_v49, %v680_v46  ;;  %v686_v57 = vadd.f32 %v685_v54, %v4777_v5  ;;  %v4264_v36 = vpack.c.bf16 %v1035_v23, %v1033_v48  ;;  %v1039_v59 = vadd.f32 %v1038_v58, %v4780_v6 }
 0x16d   :  { %3819 = vmatmul.mubr.msk.bf16.gmra.mrb[176].mxu0 %vm378_vm0, %v4422_v61  ;;  %3851 = vmatmul.mubr.msk.bf16.gmra.mrb[176].mxu1 %vm378_vm0, %v4422_v61 }
 0x16e   :  { %3559 = vst [vmem:[#allocation2 + $0x440] sm:$0xff] %v4263_v55  ;;  %v4267_v62 = vpack.c.bf16 %v686_v57, %v684_v52  ;;  %1343 = vmatprep.mubr.bf16.mxu0 %v4467_v8  ;;  %3560 = vst [vmem:[#allocation2 + $0x448] sm:$0xff] %v4264_v36  ;;  %v4268_v63 = vpack.c.bf16 %v1039_v59, %v1037_v56  ;;  %1696 = vmatprep.mubr.bf16.mxu1 %v4467_v8 }
 0x170   :  { %3563 = vst [vmem:[#allocation2 + $0x460] sm:$0xff] %v4267_v62  ;;  %v689_v39 = vpop.f32.mrb[72].mxu0  ;;  %3564 = vst [vmem:[#allocation2 + $0x468] sm:$0xff] %v4268_v63  ;;  %v1042_v1 = vpop.f32.mrb[72].mxu1 }
 0x171   :  { %v690_v0 = vadd.f32 %v689_v39, %v4772_v3  ;;  %v691_v2 = vpop.f32.mrb[73].mxu0  ;;  %v1043_v7 = vadd.f32 %v1042_v1, %v4775_v4  ;;  %v1044_v10 = vpop.f32.mrb[73].mxu1  ;;  %v4425_v1 = vld [vmem:[%s5570_s0 + $0x78] sm:$0xff]  }
 0x172   :  { %v692_v9 = vadd.f32 %v691_v2, %v4777_v5  ;;  %v693_v11 = vpop.f32.mrb[74].mxu0  ;;  %v1045_v12 = vadd.f32 %v1044_v10, %v4780_v6  ;;  %v1046_v13 = vpop.f32.mrb[74].mxu1 }
 0x173   :  { %v694_v26 = vadd.f32 %v693_v11, %v4772_v3  ;;  %v695_v14 = vpop.f32.mrb[75].mxu0  ;;  %v1047_v16 = vadd.f32 %v1046_v13, %v4775_v4  ;;  %v1048_v18 = vpop.f32.mrb[75].mxu1 }
 0x174   :  { %v4271_v15 = vpack.c.bf16 %v692_v9, %v690_v0  ;;  %v696_v17 = vadd.f32 %v695_v14, %v4777_v5  ;;  %v4272_v37 = vpack.c.bf16 %v1045_v12, %v1043_v7  ;;  %v1049_v19 = vadd.f32 %v1048_v18, %v4780_v6 }
 0x175   :  { %3820 = vmatmul.mubr.msk.bf16.gmra.mrb[180].mxu0 %vm378_vm0, %v4423_v20  ;;  %3852 = vmatmul.mubr.msk.bf16.gmra.mrb[180].mxu1 %vm378_vm0, %v4423_v20 }
 0x176   :  { %3567 = vst [vmem:[#allocation2 + $0x480] sm:$0xff] %v4271_v15  ;;  %v4275_v21 = vpack.c.bf16 %v696_v17, %v694_v26  ;;  %1353 = vmatprep.mubr.bf16.mxu0 %v4467_v8  ;;  %3568 = vst [vmem:[#allocation2 + $0x488] sm:$0xff] %v4272_v37  ;;  %v4276_v40 = vpack.c.bf16 %v1049_v19, %v1047_v16  ;;  %1706 = vmatprep.mubr.bf16.mxu1 %v4467_v8 }
 0x178   :  { %3571 = vst [vmem:[#allocation2 + $0x4a0] sm:$0xff] %v4275_v21  ;;  %v699_v22 = vpop.f32.mrb[76].mxu0  ;;  %3572 = vst [vmem:[#allocation2 + $0x4a8] sm:$0xff] %v4276_v40  ;;  %v1052_v25 = vpop.f32.mrb[76].mxu1 }
 0x179   :  { %v700_v24 = vadd.f32 %v699_v22, %v4772_v3  ;;  %v701_v27 = vpop.f32.mrb[77].mxu0  ;;  %v1053_v28 = vadd.f32 %v1052_v25, %v4775_v4  ;;  %v1054_v30 = vpop.f32.mrb[77].mxu1  ;;  %v4426_v25 = vld [vmem:[%s5570_s0 + $0x80] sm:$0xff]  }
 0x17a   :  { %v702_v29 = vadd.f32 %v701_v27, %v4777_v5  ;;  %v703_v31 = vpop.f32.mrb[78].mxu0  ;;  %v1055_v32 = vadd.f32 %v1054_v30, %v4780_v6  ;;  %v1056_v33 = vpop.f32.mrb[78].mxu1 }
 0x17b   :  { %v704_v34 = vadd.f32 %v703_v31, %v4772_v3  ;;  %v705_v35 = vpop.f32.mrb[79].mxu0  ;;  %v1057_v43 = vadd.f32 %v1056_v33, %v4775_v4  ;;  %v1058_v45 = vpop.f32.mrb[79].mxu1 }
 0x17c   :  { %v4279_v42 = vpack.c.bf16 %v702_v29, %v700_v24  ;;  %v706_v44 = vadd.f32 %v705_v35, %v4777_v5  ;;  %v4280_v38 = vpack.c.bf16 %v1055_v32, %v1053_v28  ;;  %v1059_v46 = vadd.f32 %v1058_v45, %v4780_v6 }
 0x17d   :  { %3821 = vmatmul.mubr.msk.bf16.gmra.mrb[184].mxu0 %vm378_vm0, %v4424_v47  ;;  %3853 = vmatmul.mubr.msk.bf16.gmra.mrb[184].mxu1 %vm378_vm0, %v4424_v47 }
 0x17e   :  { %3575 = vst [vmem:[#allocation2 + $0x4c0] sm:$0xff] %v4279_v42  ;;  %v4283_v41 = vpack.c.bf16 %v706_v44, %v704_v34  ;;  %1363 = vmatprep.mubr.bf16.mxu0 %v4467_v8  ;;  %3576 = vst [vmem:[#allocation2 + $0x4c8] sm:$0xff] %v4280_v38  ;;  %v4284_v48 = vpack.c.bf16 %v1059_v46, %v1057_v43  ;;  %1716 = vmatprep.mubr.bf16.mxu1 %v4467_v8 }
 0x180   :  { %3579 = vst [vmem:[#allocation2 + $0x4e0] sm:$0xff] %v4283_v41  ;;  %v709_v49 = vpop.f32.mrb[80].mxu0  ;;  %3580 = vst [vmem:[#allocation2 + $0x4e8] sm:$0xff] %v4284_v48  ;;  %v1062_v51 = vpop.f32.mrb[80].mxu1 }
 0x181   :  { %v710_v50 = vadd.f32 %v709_v49, %v4772_v3  ;;  %v711_v23 = vpop.f32.mrb[81].mxu0  ;;  %v1063_v52 = vadd.f32 %v1062_v51, %v4775_v4  ;;  %v1064_v54 = vpop.f32.mrb[81].mxu1  ;;  %v4427_v51 = vld [vmem:[%s5570_s0 + $0x88] sm:$0xff]  }
 0x182   :  { %v712_v53 = vadd.f32 %v711_v23, %v4777_v5  ;;  %v713_v55 = vpop.f32.mrb[82].mxu0  ;;  %v1065_v56 = vadd.f32 %v1064_v54, %v4780_v6  ;;  %v1066_v58 = vpop.f32.mrb[82].mxu1 }
 0x183   :  { %v714_v57 = vadd.f32 %v713_v55, %v4772_v3  ;;  %v715_v36 = vpop.f32.mrb[83].mxu0  ;;  %v1067_v61 = vadd.f32 %v1066_v58, %v4775_v4  ;;  %v1068_v63 = vpop.f32.mrb[83].mxu1 }
 0x184   :  { %v4287_v59 = vpack.c.bf16 %v712_v53, %v710_v50  ;;  %v716_v62 = vadd.f32 %v715_v36, %v4777_v5  ;;  %v4288_v39 = vpack.c.bf16 %v1065_v56, %v1063_v52  ;;  %v1069_v0 = vadd.f32 %v1068_v63, %v4780_v6 }
 0x185   :  { %3822 = vmatmul.mubr.msk.bf16.gmra.mrb[188].mxu0 %vm378_vm0, %v4425_v1  ;;  %3854 = vmatmul.mubr.msk.bf16.gmra.mrb[188].mxu1 %vm378_vm0, %v4425_v1 }
 0x186   :  { %3583 = vst [vmem:[#allocation2 + $0x500] sm:$0xff] %v4287_v59  ;;  %v4291_v2 = vpack.c.bf16 %v716_v62, %v714_v57  ;;  %1373 = vmatprep.mubr.bf16.mxu0 %v4467_v8  ;;  %3584 = vst [vmem:[#allocation2 + $0x508] sm:$0xff] %v4288_v39  ;;  %v4292_v7 = vpack.c.bf16 %v1069_v0, %v1067_v61  ;;  %1726 = vmatprep.mubr.bf16.mxu1 %v4467_v8 }
 0x188   :  { %3587 = vst [vmem:[#allocation2 + $0x520] sm:$0xff] %v4291_v2  ;;  %v719_v9 = vpop.f32.mrb[84].mxu0  ;;  %3588 = vst [vmem:[#allocation2 + $0x528] sm:$0xff] %v4292_v7  ;;  %v1072_v11 = vpop.f32.mrb[84].mxu1 }
 0x189   :  { %v720_v10 = vadd.f32 %v719_v9, %v4772_v3  ;;  %v721_v12 = vpop.f32.mrb[85].mxu0  ;;  %v1073_v26 = vadd.f32 %v1072_v11, %v4775_v4  ;;  %v1074_v14 = vpop.f32.mrb[85].mxu1  ;;  %v4428_v11 = vld [vmem:[%s5570_s0 + $0x90] sm:$0xff]  }
 0x18a   :  { %v722_v13 = vadd.f32 %v721_v12, %v4777_v5  ;;  %v723_v15 = vpop.f32.mrb[86].mxu0  ;;  %v1075_v16 = vadd.f32 %v1074_v14, %v4780_v6  ;;  %v1076_v18 = vpop.f32.mrb[86].mxu1 }
 0x18b   :  { %v724_v17 = vadd.f32 %v723_v15, %v4772_v3  ;;  %v725_v37 = vpop.f32.mrb[87].mxu0  ;;  %v1077_v20 = vadd.f32 %v1076_v18, %v4775_v4  ;;  %v1078_v40 = vpop.f32.mrb[87].mxu1 }
 0x18c   :  { %v4295_v19 = vpack.c.bf16 %v722_v13, %v720_v10  ;;  %v726_v21 = vadd.f32 %v725_v37, %v4777_v5  ;;  %v4296_v22 = vpack.c.bf16 %v1075_v16, %v1073_v26  ;;  %v1079_v24 = vadd.f32 %v1078_v40, %v4780_v6 }
 0x18d   :  { %3823 = vmatmul.mubr.msk.bf16.gmra.mrb[192].mxu0 %vm378_vm0, %v4426_v25  ;;  %3855 = vmatmul.mubr.msk.bf16.gmra.mrb[192].mxu1 %vm378_vm0, %v4426_v25 }
 0x18e   :  { %3591 = vst [vmem:[#allocation2 + $0x540] sm:$0xff] %v4295_v19  ;;  %v4299_v27 = vpack.c.bf16 %v726_v21, %v724_v17  ;;  %1383 = vmatprep.mubr.bf16.mxu0 %v4467_v8  ;;  %3592 = vst [vmem:[#allocation2 + $0x548] sm:$0xff] %v4296_v22  ;;  %v4300_v28 = vpack.c.bf16 %v1079_v24, %v1077_v20  ;;  %1736 = vmatprep.mubr.bf16.mxu1 %v4467_v8 }
 0x190   :  { %3595 = vst [vmem:[#allocation2 + $0x560] sm:$0xff] %v4299_v27  ;;  %v729_v29 = vpop.f32.mrb[88].mxu0  ;;  %3596 = vst [vmem:[#allocation2 + $0x568] sm:$0xff] %v4300_v28  ;;  %v1082_v31 = vpop.f32.mrb[88].mxu1 }
 0x191   :  { %v730_v30 = vadd.f32 %v729_v29, %v4772_v3  ;;  %v731_v32 = vpop.f32.mrb[89].mxu0  ;;  %v1083_v34 = vadd.f32 %v1082_v31, %v4775_v4  ;;  %v1084_v35 = vpop.f32.mrb[89].mxu1  ;;  %v4429_v31 = vld [vmem:[%s5570_s0 + $0x98] sm:$0xff]  }
 0x192   :  { %v732_v33 = vadd.f32 %v731_v32, %v4777_v5  ;;  %v733_v42 = vpop.f32.mrb[90].mxu0  ;;  %v1085_v43 = vadd.f32 %v1084_v35, %v4780_v6  ;;  %v1086_v45 = vpop.f32.mrb[90].mxu1 }
 0x193   :  { %v734_v44 = vadd.f32 %v733_v42, %v4772_v3  ;;  %v735_v38 = vpop.f32.mrb[91].mxu0  ;;  %v1087_v47 = vadd.f32 %v1086_v45, %v4775_v4  ;;  %v1088_v48 = vpop.f32.mrb[91].mxu1 }
 0x194   :  { %v4303_v46 = vpack.c.bf16 %v732_v33, %v730_v30  ;;  %v736_v41 = vadd.f32 %v735_v38, %v4777_v5  ;;  %v4304_v49 = vpack.c.bf16 %v1085_v43, %v1083_v34  ;;  %v1089_v50 = vadd.f32 %v1088_v48, %v4780_v6 }
 0x195   :  { %3824 = vmatmul.mubr.msk.bf16.gmra.mrb[196].mxu0 %vm378_vm0, %v4427_v51  ;;  %3856 = vmatmul.mubr.msk.bf16.gmra.mrb[196].mxu1 %vm378_vm0, %v4427_v51 }
 0x196   :  { %3599 = vst [vmem:[#allocation2 + $0x580] sm:$0xff] %v4303_v46  ;;  %v4307_v23 = vpack.c.bf16 %v736_v41, %v734_v44  ;;  %1393 = vmatprep.mubr.bf16.mxu0 %v4467_v8  ;;  %3600 = vst [vmem:[#allocation2 + $0x588] sm:$0xff] %v4304_v49  ;;  %v4308_v52 = vpack.c.bf16 %v1089_v50, %v1087_v47  ;;  %1746 = vmatprep.mubr.bf16.mxu1 %v4467_v8 }
 0x198   :  { %3603 = vst [vmem:[#allocation2 + $0x5a0] sm:$0xff] %v4307_v23  ;;  %v739_v53 = vpop.f32.mrb[92].mxu0  ;;  %3604 = vst [vmem:[#allocation2 + $0x5a8] sm:$0xff] %v4308_v52  ;;  %v1092_v55 = vpop.f32.mrb[92].mxu1 }
 0x199   :  { %v740_v54 = vadd.f32 %v739_v53, %v4772_v3  ;;  %v741_v56 = vpop.f32.mrb[93].mxu0  ;;  %v1093_v57 = vadd.f32 %v1092_v55, %v4775_v4  ;;  %v1094_v36 = vpop.f32.mrb[93].mxu1  ;;  %v4430_v55 = vld [vmem:[%s5570_s0 + $0xa0] sm:$0xff]  }
 0x19a   :  { %v742_v58 = vadd.f32 %v741_v56, %v4777_v5  ;;  %v743_v59 = vpop.f32.mrb[94].mxu0  ;;  %v1095_v61 = vadd.f32 %v1094_v36, %v4780_v6  ;;  %v1096_v63 = vpop.f32.mrb[94].mxu1 }
 0x19b   :  { %v744_v62 = vadd.f32 %v743_v59, %v4772_v3  ;;  %v745_v39 = vpop.f32.mrb[95].mxu0  ;;  %v1097_v1 = vadd.f32 %v1096_v63, %v4775_v4  ;;  %v1098_v7 = vpop.f32.mrb[95].mxu1 }
 0x19c   :  { %v4311_v0 = vpack.c.bf16 %v742_v58, %v740_v54  ;;  %v746_v2 = vadd.f32 %v745_v39, %v4777_v5  ;;  %v4312_v9 = vpack.c.bf16 %v1095_v61, %v1093_v57  ;;  %v1099_v10 = vadd.f32 %v1098_v7, %v4780_v6 }
 0x19d   :  { %3825 = vmatmul.mubr.msk.bf16.gmra.mrb[200].mxu0 %vm378_vm0, %v4428_v11  ;;  %3857 = vmatmul.mubr.msk.bf16.gmra.mrb[200].mxu1 %vm378_vm0, %v4428_v11 }
 0x19e   :  { %3607 = vst [vmem:[#allocation2 + $0x5c0] sm:$0xff] %v4311_v0  ;;  %v4315_v12 = vpack.c.bf16 %v746_v2, %v744_v62  ;;  %1403 = vmatprep.mubr.bf16.mxu0 %v4467_v8  ;;  %3608 = vst [vmem:[#allocation2 + $0x5c8] sm:$0xff] %v4312_v9  ;;  %v4316_v26 = vpack.c.bf16 %v1099_v10, %v1097_v1  ;;  %1756 = vmatprep.mubr.bf16.mxu1 %v4467_v8 }
 0x1a0   :  { %3611 = vst [vmem:[#allocation2 + $0x5e0] sm:$0xff] %v4315_v12  ;;  %v749_v13 = vpop.f32.mrb[96].mxu0  ;;  %3612 = vst [vmem:[#allocation2 + $0x5e8] sm:$0xff] %v4316_v26  ;;  %v1102_v15 = vpop.f32.mrb[96].mxu1 }
 0x1a1   :  { %v750_v14 = vadd.f32 %v749_v13, %v4772_v3  ;;  %v751_v16 = vpop.f32.mrb[97].mxu0  ;;  %v1103_v17 = vadd.f32 %v1102_v15, %v4775_v4  ;;  %v1104_v37 = vpop.f32.mrb[97].mxu1  ;;  %v4431_v15 = vld [vmem:[%s5570_s0 + $0xa8] sm:$0xff]  }
 0x1a2   :  { %v752_v18 = vadd.f32 %v751_v16, %v4777_v5  ;;  %v753_v19 = vpop.f32.mrb[98].mxu0  ;;  %v1105_v20 = vadd.f32 %v1104_v37, %v4780_v6  ;;  %v1106_v40 = vpop.f32.mrb[98].mxu1 }
 0x1a3   :  { %v754_v21 = vadd.f32 %v753_v19, %v4772_v3  ;;  %v755_v22 = vpop.f32.mrb[99].mxu0  ;;  %v1107_v25 = vadd.f32 %v1106_v40, %v4775_v4  ;;  %v1108_v28 = vpop.f32.mrb[99].mxu1 }
 0x1a4   :  { %v4319_v24 = vpack.c.bf16 %v752_v18, %v750_v14  ;;  %v756_v27 = vadd.f32 %v755_v22, %v4777_v5  ;;  %v4320_v29 = vpack.c.bf16 %v1105_v20, %v1103_v17  ;;  %v1109_v30 = vadd.f32 %v1108_v28, %v4780_v6 }
 0x1a5   :  { %3826 = vmatmul.mubr.msk.bf16.gmra.mrb[204].mxu0 %vm378_vm0, %v4429_v31  ;;  %3858 = vmatmul.mubr.msk.bf16.gmra.mrb[204].mxu1 %vm378_vm0, %v4429_v31 }
 0x1a6   :  { %3615 = vst [vmem:[#allocation2 + $0x600] sm:$0xff] %v4319_v24  ;;  %v4323_v32 = vpack.c.bf16 %v756_v27, %v754_v21  ;;  %1413 = vmatprep.mubr.bf16.mxu0 %v4467_v8  ;;  %3616 = vst [vmem:[#allocation2 + $0x608] sm:$0xff] %v4320_v29  ;;  %v4324_v34 = vpack.c.bf16 %v1109_v30, %v1107_v25  ;;  %1766 = vmatprep.mubr.bf16.mxu1 %v4467_v8 }
 0x1a8   :  { %3619 = vst [vmem:[#allocation2 + $0x620] sm:$0xff] %v4323_v32  ;;  %v759_v33 = vpop.f32.mrb[100].mxu0  ;;  %3620 = vst [vmem:[#allocation2 + $0x628] sm:$0xff] %v4324_v34  ;;  %v1112_v42 = vpop.f32.mrb[100].mxu1 }
 0x1a9   :  { %v760_v35 = vadd.f32 %v759_v33, %v4772_v3  ;;  %v761_v43 = vpop.f32.mrb[101].mxu0  ;;  %v1113_v44 = vadd.f32 %v1112_v42, %v4775_v4  ;;  %v1114_v38 = vpop.f32.mrb[101].mxu1  ;;  %v4432_v42 = vld [vmem:[%s5570_s0 + $0xb0] sm:$0xff]  }
 0x1aa   :  { %v762_v45 = vadd.f32 %v761_v43, %v4777_v5  ;;  %v763_v46 = vpop.f32.mrb[102].mxu0  ;;  %v1115_v47 = vadd.f32 %v1114_v38, %v4780_v6  ;;  %v1116_v48 = vpop.f32.mrb[102].mxu1 }
 0x1ab   :  { %v764_v41 = vadd.f32 %v763_v46, %v4772_v3  ;;  %v765_v49 = vpop.f32.mrb[103].mxu0  ;;  %v1117_v51 = vadd.f32 %v1116_v48, %v4775_v4  ;;  %v1118_v52 = vpop.f32.mrb[103].mxu1 }
 0x1ac   :  { %v4327_v50 = vpack.c.bf16 %v762_v45, %v760_v35  ;;  %v766_v23 = vadd.f32 %v765_v49, %v4777_v5  ;;  %v4328_v53 = vpack.c.bf16 %v1115_v47, %v1113_v44  ;;  %v1119_v54 = vadd.f32 %v1118_v52, %v4780_v6 }
 0x1ad   :  { %3827 = vmatmul.mubr.msk.bf16.gmra.mrb[208].mxu0 %vm378_vm0, %v4430_v55  ;;  %3859 = vmatmul.mubr.msk.bf16.gmra.mrb[208].mxu1 %vm378_vm0, %v4430_v55 }
 0x1ae   :  { %3623 = vst [vmem:[#allocation2 + $0x640] sm:$0xff] %v4327_v50  ;;  %v4331_v56 = vpack.c.bf16 %v766_v23, %v764_v41  ;;  %1423 = vmatprep.mubr.bf16.mxu0 %v4467_v8  ;;  %3624 = vst [vmem:[#allocation2 + $0x648] sm:$0xff] %v4328_v53  ;;  %v4332_v57 = vpack.c.bf16 %v1119_v54, %v1117_v51  ;;  %1776 = vmatprep.mubr.bf16.mxu1 %v4467_v8 }
 0x1b0   :  { %3627 = vst [vmem:[#allocation2 + $0x660] sm:$0xff] %v4331_v56  ;;  %v769_v58 = vpop.f32.mrb[104].mxu0  ;;  %3628 = vst [vmem:[#allocation2 + $0x668] sm:$0xff] %v4332_v57  ;;  %v1122_v59 = vpop.f32.mrb[104].mxu1 }
 0x1b1   :  { %v770_v36 = vadd.f32 %v769_v58, %v4772_v3  ;;  %v771_v61 = vpop.f32.mrb[105].mxu0  ;;  %v1123_v62 = vadd.f32 %v1122_v59, %v4775_v4  ;;  %v1124_v39 = vpop.f32.mrb[105].mxu1  ;;  %v4433_v59 = vld [vmem:[%s5570_s0 + $0xb8] sm:$0xff]  }
 0x1b2   :  { %v772_v63 = vadd.f32 %v771_v61, %v4777_v5  ;;  %v773_v0 = vpop.f32.mrb[106].mxu0  ;;  %v1125_v1 = vadd.f32 %v1124_v39, %v4780_v6  ;;  %v1126_v7 = vpop.f32.mrb[106].mxu1 }
 0x1b3   :  { %v774_v2 = vadd.f32 %v773_v0, %v4772_v3  ;;  %v775_v9 = vpop.f32.mrb[107].mxu0  ;;  %v1127_v11 = vadd.f32 %v1126_v7, %v4775_v4  ;;  %v1128_v26 = vpop.f32.mrb[107].mxu1 }
 0x1b4   :  { %v4335_v10 = vpack.c.bf16 %v772_v63, %v770_v36  ;;  %v776_v12 = vadd.f32 %v775_v9, %v4777_v5  ;;  %v4336_v13 = vpack.c.bf16 %v1125_v1, %v1123_v62  ;;  %v1129_v14 = vadd.f32 %v1128_v26, %v4780_v6 }
 0x1b5   :  { %3828 = vmatmul.mubr.msk.bf16.gmra.mrb[212].mxu0 %vm378_vm0, %v4431_v15  ;;  %3860 = vmatmul.mubr.msk.bf16.gmra.mrb[212].mxu1 %vm378_vm0, %v4431_v15 }
 0x1b6   :  { %3631 = vst [vmem:[#allocation2 + $0x680] sm:$0xff] %v4335_v10  ;;  %v4339_v16 = vpack.c.bf16 %v776_v12, %v774_v2  ;;  %1433 = vmatprep.mubr.bf16.mxu0 %v4467_v8  ;;  %3632 = vst [vmem:[#allocation2 + $0x688] sm:$0xff] %v4336_v13  ;;  %v4340_v17 = vpack.c.bf16 %v1129_v14, %v1127_v11  ;;  %1786 = vmatprep.mubr.bf16.mxu1 %v4467_v8 }
 0x1b8   :  { %3635 = vst [vmem:[#allocation2 + $0x6a0] sm:$0xff] %v4339_v16  ;;  %v779_v18 = vpop.f32.mrb[108].mxu0  ;;  %3636 = vst [vmem:[#allocation2 + $0x6a8] sm:$0xff] %v4340_v17  ;;  %v1132_v19 = vpop.f32.mrb[108].mxu1 }
 0x1b9   :  { %v780_v37 = vadd.f32 %v779_v18, %v4772_v3  ;;  %v781_v20 = vpop.f32.mrb[109].mxu0  ;;  %v1133_v21 = vadd.f32 %v1132_v19, %v4775_v4  ;;  %v1134_v22 = vpop.f32.mrb[109].mxu1  ;;  %v4434_v19 = vld [vmem:[%s5570_s0 + $0xc0] sm:$0xff]  }
 0x1ba   :  { %v782_v40 = vadd.f32 %v781_v20, %v4777_v5  ;;  %v783_v24 = vpop.f32.mrb[110].mxu0  ;;  %v1135_v25 = vadd.f32 %v1134_v22, %v4780_v6  ;;  %v1136_v28 = vpop.f32.mrb[110].mxu1 }
 0x1bb   :  { %v784_v27 = vadd.f32 %v783_v24, %v4772_v3  ;;  %v785_v29 = vpop.f32.mrb[111].mxu0  ;;  %v1137_v31 = vadd.f32 %v1136_v28, %v4775_v4  ;;  %v1138_v34 = vpop.f32.mrb[111].mxu1 }
 0x1bc   :  { %v4343_v30 = vpack.c.bf16 %v782_v40, %v780_v37  ;;  %v786_v32 = vadd.f32 %v785_v29, %v4777_v5  ;;  %v4344_v33 = vpack.c.bf16 %v1135_v25, %v1133_v21  ;;  %v1139_v35 = vadd.f32 %v1138_v34, %v4780_v6 }
 0x1bd   :  { %3829 = vmatmul.mubr.msk.bf16.gmra.mrb[216].mxu0 %vm378_vm0, %v4432_v42  ;;  %3861 = vmatmul.mubr.msk.bf16.gmra.mrb[216].mxu1 %vm378_vm0, %v4432_v42 }
 0x1be   :  { %3639 = vst [vmem:[#allocation2 + $0x6c0] sm:$0xff] %v4343_v30  ;;  %v4347_v43 = vpack.c.bf16 %v786_v32, %v784_v27  ;;  %1443 = vmatprep.mubr.bf16.mxu0 %v4467_v8  ;;  %3640 = vst [vmem:[#allocation2 + $0x6c8] sm:$0xff] %v4344_v33  ;;  %v4348_v44 = vpack.c.bf16 %v1139_v35, %v1137_v31  ;;  %1796 = vmatprep.mubr.bf16.mxu1 %v4467_v8 }
 0x1c0   :  { %3643 = vst [vmem:[#allocation2 + $0x6e0] sm:$0xff] %v4347_v43  ;;  %v789_v45 = vpop.f32.mrb[112].mxu0  ;;  %3644 = vst [vmem:[#allocation2 + $0x6e8] sm:$0xff] %v4348_v44  ;;  %v1142_v46 = vpop.f32.mrb[112].mxu1 }
 0x1c1   :  { %v790_v38 = vadd.f32 %v789_v45, %v4772_v3  ;;  %v791_v47 = vpop.f32.mrb[113].mxu0  ;;  %v1143_v41 = vadd.f32 %v1142_v46, %v4775_v4  ;;  %v1144_v49 = vpop.f32.mrb[113].mxu1  ;;  %v4435_v46 = vld [vmem:[%s5570_s0 + $0xc8] sm:$0xff]  }
 0x1c2   :  { %v792_v48 = vadd.f32 %v791_v47, %v4777_v5  ;;  %v793_v50 = vpop.f32.mrb[114].mxu0  ;;  %v1145_v51 = vadd.f32 %v1144_v49, %v4780_v6  ;;  %v1146_v52 = vpop.f32.mrb[114].mxu1 }
 0x1c3   :  { %v794_v23 = vadd.f32 %v793_v50, %v4772_v3  ;;  %v795_v53 = vpop.f32.mrb[115].mxu0  ;;  %v1147_v55 = vadd.f32 %v1146_v52, %v4775_v4  ;;  %v1148_v57 = vpop.f32.mrb[115].mxu1 }
 0x1c4   :  { %v4351_v54 = vpack.c.bf16 %v792_v48, %v790_v38  ;;  %v796_v56 = vadd.f32 %v795_v53, %v4777_v5  ;;  %v4352_v58 = vpack.c.bf16 %v1145_v51, %v1143_v41  ;;  %v1149_v36 = vadd.f32 %v1148_v57, %v4780_v6 }
 0x1c5   :  { %3830 = vmatmul.mubr.msk.bf16.gmra.mrb[220].mxu0 %vm378_vm0, %v4433_v59  ;;  %3862 = vmatmul.mubr.msk.bf16.gmra.mrb[220].mxu1 %vm378_vm0, %v4433_v59  ;;  %v120_v57 = vsub.s32 5, %v4756_v60 }
 0x1c6   :  { %3647 = vst [vmem:[#allocation2 + $0x700] sm:$0xff] %v4351_v54  ;;  %v4355_v61 = vpack.c.bf16 %v796_v56, %v794_v23  ;;  %1453 = vmatprep.mubr.bf16.mxu0 %v4467_v8  ;;  %3648 = vst [vmem:[#allocation2 + $0x708] sm:$0xff] %v4352_v58  ;;  %v4356_v62 = vpack.c.bf16 %v1149_v36, %v1147_v55  ;;  %1806 = vmatprep.mubr.bf16.mxu1 %v4467_v8  ;;  %v116_v23 = vsub.s32 4, %v4756_v60 }
 0x1c7   :  { %v124_v56 = vsub.s32 6, %v4756_v60 }
 0x1c8   :  { %3651 = vst [vmem:[#allocation2 + $0x720] sm:$0xff] %v4355_v61  ;;  %v799_v63 = vpop.f32.mrb[116].mxu0  ;;  %3652 = vst [vmem:[#allocation2 + $0x728] sm:$0xff] %v4356_v62  ;;  %v1152_v0 = vpop.f32.mrb[116].mxu1  ;;  %v128_v62 = vsub.s32 7, %v4756_v60 }
 0x1c9   :  { %v800_v39 = vadd.f32 %v799_v63, %v4772_v3  ;;  %v801_v1 = vpop.f32.mrb[117].mxu0  ;;  %v1153_v2 = vadd.f32 %v1152_v0, %v4775_v4  ;;  %v1154_v9 = vpop.f32.mrb[117].mxu1 }
 0x1ca   :  { %v802_v7 = vadd.f32 %v801_v1, %v4777_v5  ;;  %v803_v10 = vpop.f32.mrb[118].mxu0  ;;  %v1155_v11 = vadd.f32 %v1154_v9, %v4780_v6  ;;  %v1156_v26 = vpop.f32.mrb[118].mxu1  ;;  %v4436_v9 = vld [vmem:[%s5570_s0 + $0xd0] sm:$0xff]  }
 0x1cb   :  { %v804_v12 = vadd.f32 %v803_v10, %v4772_v3  ;;  %v805_v13 = vpop.f32.mrb[119].mxu0  ;;  %v1157_v15 = vadd.f32 %v1156_v26, %v4775_v4  ;;  %v1158_v17 = vpop.f32.mrb[119].mxu1 }
 0x1cc   :  { %v4359_v14 = vpack.c.bf16 %v802_v7, %v800_v39  ;;  %v806_v16 = vadd.f32 %v805_v13, %v4777_v5  ;;  %v4360_v18 = vpack.c.bf16 %v1155_v11, %v1153_v2  ;;  %v1159_v37 = vadd.f32 %v1158_v17, %v4780_v6 }
 0x1cd   :  { %3831 = vmatmul.mubr.msk.bf16.gmra.mrb[224].mxu0 %vm378_vm0, %v4434_v19  ;;  %3863 = vmatmul.mubr.msk.bf16.gmra.mrb[224].mxu1 %vm378_vm0, %v4434_v19 }
 0x1ce   :  { %3655 = vst [vmem:[#allocation2 + $0x740] sm:$0xff] %v4359_v14  ;;  %v4363_v20 = vpack.c.bf16 %v806_v16, %v804_v12  ;;  %1463 = vmatprep.mubr.bf16.mxu0 %v4467_v8  ;;  %3656 = vst [vmem:[#allocation2 + $0x748] sm:$0xff] %v4360_v18  ;;  %v4364_v21 = vpack.c.bf16 %v1159_v37, %v1157_v15  ;;  %1816 = vmatprep.mubr.bf16.mxu1 %v4467_v8 }
 0x1d0   :  { %3659 = vst [vmem:[#allocation2 + $0x760] sm:$0xff] %v4363_v20  ;;  %v809_v40 = vpop.f32.mrb[120].mxu0  ;;  %3660 = vst [vmem:[#allocation2 + $0x768] sm:$0xff] %v4364_v21  ;;  %v1162_v24 = vpop.f32.mrb[120].mxu1 }
 0x1d1   :  { %v810_v22 = vadd.f32 %v809_v40, %v4772_v3  ;;  %v811_v25 = vpop.f32.mrb[121].mxu0  ;;  %v1163_v27 = vadd.f32 %v1162_v24, %v4775_v4  ;;  %v1164_v29 = vpop.f32.mrb[121].mxu1 }
 0x1d2   :  { %v812_v28 = vadd.f32 %v811_v25, %v4777_v5  ;;  %v813_v30 = vpop.f32.mrb[122].mxu0  ;;  %v1165_v31 = vadd.f32 %v1164_v29, %v4780_v6  ;;  %v1166_v34 = vpop.f32.mrb[122].mxu1  ;;  %v4438_v29 = vld [vmem:[%s5570_s0 + $0xd8] sm:$0xff]  }
 0x1d3   :  { %v814_v32 = vadd.f32 %v813_v30, %v4772_v3  ;;  %v815_v33 = vpop.f32.mrb[123].mxu0  ;;  %v1167_v42 = vadd.f32 %v1166_v34, %v4775_v4  ;;  %v1168_v44 = vpop.f32.mrb[123].mxu1 }
 0x1d4   :  { %v4367_v35 = vpack.c.bf16 %v812_v28, %v810_v22  ;;  %v816_v43 = vadd.f32 %v815_v33, %v4777_v5  ;;  %v4368_v45 = vpack.c.bf16 %v1165_v31, %v1163_v27  ;;  %v1169_v38 = vadd.f32 %v1168_v44, %v4780_v6 }
 0x1d5   :  { %3832 = vmatmul.mubr.msk.bf16.gmra.mrb[228].mxu0 %vm378_vm0, %v4435_v46  ;;  %3864 = vmatmul.mubr.msk.bf16.gmra.mrb[228].mxu1 %vm378_vm0, %v4435_v46 }
 0x1d6   :  { %3663 = vst [vmem:[#allocation2 + $0x780] sm:$0xff] %v4367_v35  ;;  %v4371_v47 = vpack.c.bf16 %v816_v43, %v814_v32  ;;  %1473 = vmatprep.mubr.bf16.mxu0 %v4467_v8  ;;  %3664 = vst [vmem:[#allocation2 + $0x788] sm:$0xff] %v4368_v45  ;;  %v4372_v41 = vpack.c.bf16 %v1169_v38, %v1167_v42  ;;  %1826 = vmatprep.mubr.bf16.mxu1 %v4467_v8 }
 0x1d8   :  { %3667 = vst [vmem:[#allocation2 + $0x7a0] sm:$0xff] %v4371_v47  ;;  %v819_v48 = vpop.f32.mrb[124].mxu0  ;;  %3668 = vst [vmem:[#allocation2 + $0x7a8] sm:$0xff] %v4372_v41  ;;  %v1172_v50 = vpop.f32.mrb[124].mxu1 }
 0x1d9   :  { %v820_v49 = vadd.f32 %v819_v48, %v4772_v3  ;;  %v821_v51 = vpop.f32.mrb[125].mxu0  ;;  %v1173_v52 = vadd.f32 %v1172_v50, %v4775_v4  ;;  %v1174_v54 = vpop.f32.mrb[125].mxu1 }
 0x1da   :  { %v822_v53 = vadd.f32 %v821_v51, %v4777_v5  ;;  %v823_v55 = vpop.f32.mrb[126].mxu0  ;;  %v1175_v58 = vadd.f32 %v1174_v54, %v4780_v6  ;;  %v1176_v59 = vpop.f32.mrb[126].mxu1 }
 0x1db   :  { %v824_v36 = vadd.f32 %v823_v55, %v4772_v3  ;;  %v825_v61 = vpop.f32.mrb[127].mxu0  ;;  %v1177_v39 = vadd.f32 %v1176_v59, %v4775_v4  ;;  %v1178_v1 = vpop.f32.mrb[127].mxu1  ;;  %v4437_v3 = vld [vmem:[%s5572_s2] sm:$0xff] }
 0x1dc   :  { %v4375_v63 = vpack.c.bf16 %v822_v53, %v820_v49  ;;  %v826_v0 = vadd.f32 %v825_v61, %v4777_v5  ;;  %v4376_v2 = vpack.c.bf16 %v1175_v58, %v1173_v52  ;;  %v1179_v7 = vadd.f32 %v1178_v1, %v4780_v6  ;;  %v4439_v53 = vld [vmem:[%s5570_s0 + $0xe0] sm:$0xff]  }
 0x1dd   :  { %3833 = vmatmul.mubr.msk.bf16.gmra.mrb[232].mxu0 %vm378_vm0, %v4436_v9  ;;  %v5258_v60 = vrot.slane %v4437_v3, %v116_v23  ;;  %3865 = vmatmul.mubr.msk.bf16.gmra.mrb[232].mxu1 %vm378_vm0, %v4436_v9  ;;  %v5261_v5 = vrot.slane %v4437_v3, %v124_v56  ;;  %v5263_v10 = vrot.slane %v4437_v3, %v120_v57 }
 0x1de   :  { %3671 = vst [vmem:[#allocation2 + $0x7c0] sm:$0xff] %v4375_v63  ;;  %v4379_v4 = vpack.c.bf16 %v826_v0, %v824_v36  ;;  %1483 = vmatprep.mubr.bf16.mxu0 %v4467_v8  ;;  %3672 = vst [vmem:[#allocation2 + $0x7c8] sm:$0xff] %v4376_v2  ;;  %v4380_v6 = vpack.c.bf16 %v1179_v7, %v1177_v39  ;;  %v5266_v11 = vrot.slane %v4437_v3, %v128_v62 }
 0x1df   :  { %1836 = vmatprep.mubr.bf16.mxu1 %v4467_v8 }
 0x1e0   :  { %3675 = vst [vmem:[#allocation2 + $0x7e0] sm:$0xff] %v4379_v4  ;;  %v1215_v12 = vpop.f32.mrb[128].mxu0  ;;  %3676 = vst [vmem:[#allocation2 + $0x7e8] sm:$0xff] %v4380_v6  ;;  %v1568_v13 = vpop.f32.mrb[128].mxu1 }
 0x1e1   :  { %v1216_v26 = vadd.f32 %v1215_v12, %v5258_v60  ;;  %v1217_v14 = vpop.f32.mrb[129].mxu0  ;;  %v1569_v15 = vadd.f32 %v1568_v13, %v5261_v5  ;;  %v1570_v17 = vpop.f32.mrb[129].mxu1 }
 0x1e2   :  { %v1218_v16 = vadd.f32 %v1217_v14, %v5263_v10  ;;  %v1219_v18 = vpop.f32.mrb[130].mxu0  ;;  %v1571_v37 = vadd.f32 %v1570_v17, %v5266_v11  ;;  %v1572_v20 = vpop.f32.mrb[130].mxu1 }
 0x1e3   :  { %v1220_v19 = vadd.f32 %v1219_v18, %v5258_v60  ;;  %v1221_v21 = vpop.f32.mrb[131].mxu0  ;;  %v1573_v22 = vadd.f32 %v1572_v20, %v5261_v5  ;;  %v1574_v25 = vpop.f32.mrb[131].mxu1 }
 0x1e4   :  { %v4129_v40 = vpack.c.bf16 %v1218_v16, %v1216_v26  ;;  %v1222_v24 = vadd.f32 %v1221_v21, %v5263_v10  ;;  %v4130_v27 = vpack.c.bf16 %v1571_v37, %v1569_v15  ;;  %v1575_v28 = vadd.f32 %v1574_v25, %v5266_v11  ;;  %v4440_v26 = vld [vmem:[%s5570_s0 + $0xe8] sm:$0xff]  }
 0x1e5   :  { %3834 = vmatmul.mubr.msk.bf16.gmra.mrb[236].mxu0 %vm378_vm0, %v4438_v29  ;;  %3866 = vmatmul.mubr.msk.bf16.gmra.mrb[236].mxu1 %vm378_vm0, %v4438_v29 }
 0x1e6   :  { %3425 = vst [vmem:[#allocation2 + $0x10] sm:$0xff] %v4129_v40  ;;  %v4133_v30 = vpack.c.bf16 %v1222_v24, %v1220_v19  ;;  %1493 = vmatprep.mubr.bf16.mxu0 %v4467_v8  ;;  %3426 = vst [vmem:[#allocation2 + $0x18] sm:$0xff] %v4130_v27  ;;  %v4134_v31 = vpack.c.bf16 %v1575_v28, %v1573_v22  ;;  %1846 = vmatprep.mubr.bf16.mxu1 %v4467_v8 }
 0x1e8   :  { %3429 = vst [vmem:[#allocation2 + $0x30] sm:$0xff] %v4133_v30  ;;  %v1225_v32 = vpop.f32.mrb[132].mxu0  ;;  %3430 = vst [vmem:[#allocation2 + $0x38] sm:$0xff] %v4134_v31  ;;  %v1578_v33 = vpop.f32.mrb[132].mxu1 }
 0x1e9   :  { %v1226_v34 = vadd.f32 %v1225_v32, %v5258_v60  ;;  %v1227_v35 = vpop.f32.mrb[133].mxu0  ;;  %v1579_v42 = vadd.f32 %v1578_v33, %v5261_v5  ;;  %v1580_v44 = vpop.f32.mrb[133].mxu1 }
 0x1ea   :  { %v1228_v43 = vadd.f32 %v1227_v35, %v5263_v10  ;;  %v1229_v45 = vpop.f32.mrb[134].mxu0  ;;  %v1581_v38 = vadd.f32 %v1580_v44, %v5266_v11  ;;  %v1582_v47 = vpop.f32.mrb[134].mxu1 }
 0x1eb   :  { %v1230_v46 = vadd.f32 %v1229_v45, %v5258_v60  ;;  %v1231_v41 = vpop.f32.mrb[135].mxu0  ;;  %v1583_v49 = vadd.f32 %v1582_v47, %v5261_v5  ;;  %v1584_v51 = vpop.f32.mrb[135].mxu1 }
 0x1ec   :  { %v4137_v48 = vpack.c.bf16 %v1228_v43, %v1226_v34  ;;  %v1232_v50 = vadd.f32 %v1231_v41, %v5263_v10  ;;  %v4138_v23 = vpack.c.bf16 %v1581_v38, %v1579_v42  ;;  %v1585_v52 = vadd.f32 %v1584_v51, %v5266_v11  ;;  %v4441_v34 = vld [vmem:[%s5570_s0 + $0xf0] sm:$0xff]  }
 0x1ed   :  { %3835 = vmatmul.mubr.msk.bf16.gmra.mrb[240].mxu0 %vm378_vm0, %v4439_v53  ;;  %3867 = vmatmul.mubr.msk.bf16.gmra.mrb[240].mxu1 %vm378_vm0, %v4439_v53 }
 0x1ee   :  { %3433 = vst [vmem:[#allocation2 + $0x50] sm:$0xff] %v4137_v48  ;;  %v4141_v54 = vpack.c.bf16 %v1232_v50, %v1230_v46  ;;  %1503 = vmatprep.mubr.bf16.mxu0 %v4467_v8  ;;  %3434 = vst [vmem:[#allocation2 + $0x58] sm:$0xff] %v4138_v23  ;;  %v4142_v55 = vpack.c.bf16 %v1585_v52, %v1583_v49  ;;  %1856 = vmatprep.mubr.bf16.mxu1 %v4467_v8 }
 0x1f0   :  { %3437 = vst [vmem:[#allocation2 + $0x70] sm:$0xff] %v4141_v54  ;;  %v1235_v56 = vpop.f32.mrb[136].mxu0  ;;  %3438 = vst [vmem:[#allocation2 + $0x78] sm:$0xff] %v4142_v55  ;;  %v1588_v58 = vpop.f32.mrb[136].mxu1 }
 0x1f1   :  { %v1236_v57 = vadd.f32 %v1235_v56, %v5258_v60  ;;  %v1237_v36 = vpop.f32.mrb[137].mxu0  ;;  %v1589_v59 = vadd.f32 %v1588_v58, %v5261_v5  ;;  %v1590_v62 = vpop.f32.mrb[137].mxu1  ;;  %v4442_v56 = vld [vmem:[%s5570_s0 + $0xf8] sm:$0xff]   ;;  %s4468_s0 = smov [#allocation2]  }
 0x1f2   :  { %v1238_v61 = vadd.f32 %v1237_v36, %v5263_v10  ;;  %v1239_v63 = vpop.f32.mrb[138].mxu0  ;;  %v1591_v39 = vadd.f32 %v1590_v62, %v5266_v11  ;;  %v1592_v1 = vpop.f32.mrb[138].mxu1  ;;  %s3684_s18 = sshll.u32 %s4468_s0, 4  ;;  %s3685_s18 = int_to_ptr.vmem [resolvable:$true] %s3684_s18 }
 0x1f3   :  { %v1240_v0 = vadd.f32 %v1239_v63, %v5258_v60  ;;  %v1241_v2 = vpop.f32.mrb[139].mxu0  ;;  %v1593_v9 = vadd.f32 %v1592_v1, %v5261_v5  ;;  %v1594_v4 = vpop.f32.mrb[139].mxu1  ;;  %s4443_s19 = scalar_lea.vmem %s3685_s18, 32768  ;;  %p4448_p1 = scmp.lt.s32.totalorder %s3685_s18, %s3685_s18 }
 0x1f4   :  { %v4145_v7 = vpack.c.bf16 %v1238_v61, %v1236_v57  ;;  %v1242_v3 = vadd.f32 %v1241_v2, %v5263_v10  ;;  %v4146_v6 = vpack.c.bf16 %v1591_v39, %v1589_v59  ;;  %v1595_v12 = vadd.f32 %v1594_v4, %v5266_v11  ;;  %p4444_p0 = scmp.ne.s32.totalorder %s3685_s18, %s4443_s19  ;;  %p4449_p2 = scmp.lt.s32.totalorder %s4443_s19, %s4443_s19 }
 0x1f5   :  { %3836 = vmatmul.mubr.msk.bf16.gmra.mrb[244].mxu0 %vm378_vm0, %v4440_v26  ;;  %3868 = vmatmul.mubr.msk.bf16.gmra.mrb[244].mxu1 %vm378_vm0, %v4440_v26 }
 0x1f6   :  { %3441 = vst [vmem:[#allocation2 + $0x90] sm:$0xff] %v4145_v7  ;;  %v4149_v13 = vpack.c.bf16 %v1242_v3, %v1240_v0  ;;  %1513 = vmatprep.mubr.bf16.mxu0 %v4467_v8  ;;  %3442 = vst [vmem:[#allocation2 + $0x98] sm:$0xff] %v4146_v6  ;;  %v4150_v14 = vpack.c.bf16 %v1595_v12, %v1593_v9  ;;  %1866 = vmatprep.mubr.bf16.mxu1 %v4467_v8  ;;  %p4450_p3 = por %p4449_p2, %p4448_p1 }
 0x1f8   :  { %3445 = vst [vmem:[#allocation2 + $0xb0] sm:$0xff] %v4149_v13  ;;  %v1245_v15 = vpop.f32.mrb[140].mxu0  ;;  %3446 = vst [vmem:[#allocation2 + $0xb8] sm:$0xff] %v4150_v14  ;;  %v1598_v17 = vpop.f32.mrb[140].mxu1  ;;  %p4451_p4 = pnand %p4450_p3, %p4444_p0 }
 0x1f9   :  { %v1246_v16 = vadd.f32 %v1245_v15, %v5258_v60  ;;  %v1247_v18 = vpop.f32.mrb[141].mxu0  ;;  %v1599_v37 = vadd.f32 %v1598_v17, %v5261_v5  ;;  %v1600_v20 = vpop.f32.mrb[141].mxu1 }
 0x1fa   :  { %v1248_v19 = vadd.f32 %v1247_v18, %v5263_v10  ;;  %v1249_v21 = vpop.f32.mrb[142].mxu0  ;;  %v1601_v40 = vadd.f32 %v1600_v20, %v5266_v11  ;;  %v1602_v24 = vpop.f32.mrb[142].mxu1 }
 0x1fb   :  { %v1250_v22 = vadd.f32 %v1249_v21, %v5258_v60  ;;  %v1251_v25 = vpop.f32.mrb[143].mxu0  ;;  %v1603_v28 = vadd.f32 %v1602_v24, %v5261_v5  ;;  %v1604_v30 = vpop.f32.mrb[143].mxu1 }
 0x1fc   :  { %v4153_v27 = vpack.c.bf16 %v1248_v19, %v1246_v16  ;;  %v1252_v29 = vadd.f32 %v1251_v25, %v5263_v10  ;;  %v4154_v31 = vpack.c.bf16 %v1601_v40, %v1599_v37  ;;  %v1605_v32 = vadd.f32 %v1604_v30, %v5266_v11 }
 0x1fd   :  { %3837 = vmatmul.mubr.msk.bf16.gmra.mrb[248].mxu0 %vm378_vm0, %v4441_v34  ;;  %3869 = vmatmul.mubr.msk.bf16.gmra.mrb[248].mxu1 %vm378_vm0, %v4441_v34 }
 0x1fe   :  { %3449 = vst [vmem:[#allocation2 + $0xd0] sm:$0xff] %v4153_v27  ;;  %v4157_v33 = vpack.c.bf16 %v1252_v29, %v1250_v22  ;;  %1523 = vmatprep.mubr.bf16.mxu0 %v4467_v8  ;;  %3450 = vst [vmem:[#allocation2 + $0xd8] sm:$0xff] %v4154_v31  ;;  %v4158_v35 = vpack.c.bf16 %v1605_v32, %v1603_v28  ;;  %1876 = vmatprep.mubr.bf16.mxu1 %v4467_v8 }
 0x200   :  { %3453 = vst [vmem:[#allocation2 + $0xf0] sm:$0xff] %v4157_v33  ;;  %v1255_v42 = vpop.f32.mrb[144].mxu0  ;;  %3454 = vst [vmem:[#allocation2 + $0xf8] sm:$0xff] %v4158_v35  ;;  %v1608_v44 = vpop.f32.mrb[144].mxu1 }
 0x201   :  { %v1256_v43 = vadd.f32 %v1255_v42, %v5258_v60  ;;  %v1257_v45 = vpop.f32.mrb[145].mxu0  ;;  %v1609_v38 = vadd.f32 %v1608_v44, %v5261_v5  ;;  %v1610_v47 = vpop.f32.mrb[145].mxu1 }
 0x202   :  { %v1258_v46 = vadd.f32 %v1257_v45, %v5263_v10  ;;  %v1259_v41 = vpop.f32.mrb[146].mxu0  ;;  %v1611_v48 = vadd.f32 %v1610_v47, %v5266_v11  ;;  %v1612_v50 = vpop.f32.mrb[146].mxu1 }
 0x203   :  { %v1260_v49 = vadd.f32 %v1259_v41, %v5258_v60  ;;  %v1261_v51 = vpop.f32.mrb[147].mxu0  ;;  %v1613_v23 = vadd.f32 %v1612_v50, %v5261_v5  ;;  %v1614_v53 = vpop.f32.mrb[147].mxu1 }
 0x204   :  { %v4161_v8 = vpack.c.bf16 %v1258_v46, %v1256_v43  ;;  %v1262_v52 = vadd.f32 %v1261_v51, %v5263_v10  ;;  %v4162_v54 = vpack.c.bf16 %v1611_v48, %v1609_v38  ;;  %v1615_v55 = vadd.f32 %v1614_v53, %v5266_v11 }
 0x205   :  { %3838 = vmatmul.mubr.msk.bf16.gmra.mrb[252].mxu0 %vm378_vm0, %v4442_v56  ;;  %3870 = vmatmul.mubr.msk.bf16.gmra.mrb[252].mxu1 %vm378_vm0, %v4442_v56 }
 0x206   :  { %3457 = vst [vmem:[#allocation2 + $0x110] sm:$0xff] %v4161_v8  ;;  %v4165_v57 = vpack.c.bf16 %v1262_v52, %v1260_v49  ;;  %3458 = vst [vmem:[#allocation2 + $0x118] sm:$0xff] %v4162_v54  ;;  %v4166_v58 = vpack.c.bf16 %v1615_v55, %v1613_v23 }
 0x208   :  { %3461 = vst [vmem:[#allocation2 + $0x130] sm:$0xff] %v4165_v57  ;;  %v1265_v36 = vpop.f32.mrb[148].mxu0  ;;  %3462 = vst [vmem:[#allocation2 + $0x138] sm:$0xff] %v4166_v58  ;;  %v1618_v61 = vpop.f32.mrb[148].mxu1 }
 0x209   :  { %v1266_v59 = vadd.f32 %v1265_v36, %v5258_v60  ;;  %v1267_v62 = vpop.f32.mrb[149].mxu0  ;;  %v1619_v63 = vadd.f32 %v1618_v61, %v5261_v5  ;;  %v1620_v0 = vpop.f32.mrb[149].mxu1 }
 0x20a   :  { %v1268_v39 = vadd.f32 %v1267_v62, %v5263_v10  ;;  %v1269_v1 = vpop.f32.mrb[150].mxu0  ;;  %v1621_v2 = vadd.f32 %v1620_v0, %v5266_v11  ;;  %v1622_v9 = vpop.f32.mrb[150].mxu1 }
 0x20b   :  { %v1270_v7 = vadd.f32 %v1269_v1, %v5258_v60  ;;  %v1271_v3 = vpop.f32.mrb[151].mxu0  ;;  %v1623_v6 = vadd.f32 %v1622_v9, %v5261_v5  ;;  %v1624_v26 = vpop.f32.mrb[151].mxu1 }
 0x20c   :  { %v4169_v4 = vpack.c.bf16 %v1268_v39, %v1266_v59  ;;  %v1272_v12 = vadd.f32 %v1271_v3, %v5263_v10  ;;  %v4170_v13 = vpack.c.bf16 %v1621_v2, %v1619_v63  ;;  %v1625_v14 = vadd.f32 %v1624_v26, %v5266_v11 }
 0x20e   :  { %3465 = vst [vmem:[#allocation2 + $0x150] sm:$0xff] %v4169_v4  ;;  %v4173_v15 = vpack.c.bf16 %v1272_v12, %v1270_v7  ;;  %3466 = vst [vmem:[#allocation2 + $0x158] sm:$0xff] %v4170_v13  ;;  %v4174_v16 = vpack.c.bf16 %v1625_v14, %v1623_v6 }
 0x210   :  { %3469 = vst [vmem:[#allocation2 + $0x170] sm:$0xff] %v4173_v15  ;;  %v1275_v17 = vpop.f32.mrb[152].mxu0  ;;  %3470 = vst [vmem:[#allocation2 + $0x178] sm:$0xff] %v4174_v16  ;;  %v1628_v37 = vpop.f32.mrb[152].mxu1 }
 0x211   :  { %v1276_v18 = vadd.f32 %v1275_v17, %v5258_v60  ;;  %v1277_v19 = vpop.f32.mrb[153].mxu0  ;;  %v1629_v20 = vadd.f32 %v1628_v37, %v5261_v5  ;;  %v1630_v40 = vpop.f32.mrb[153].mxu1 }
 0x212   :  { %v1278_v21 = vadd.f32 %v1277_v19, %v5263_v10  ;;  %v1279_v22 = vpop.f32.mrb[154].mxu0  ;;  %v1631_v24 = vadd.f32 %v1630_v40, %v5266_v11  ;;  %v1632_v27 = vpop.f32.mrb[154].mxu1 }
 0x213   :  { %v1280_v25 = vadd.f32 %v1279_v22, %v5258_v60  ;;  %v1281_v28 = vpop.f32.mrb[155].mxu0  ;;  %v1633_v30 = vadd.f32 %v1632_v27, %v5261_v5  ;;  %v1634_v32 = vpop.f32.mrb[155].mxu1 }
 0x214   :  { %v4177_v29 = vpack.c.bf16 %v1278_v21, %v1276_v18  ;;  %v1282_v31 = vadd.f32 %v1281_v28, %v5263_v10  ;;  %v4178_v34 = vpack.c.bf16 %v1631_v24, %v1629_v20  ;;  %v1635_v33 = vadd.f32 %v1634_v32, %v5266_v11 }
 0x216   :  { %3473 = vst [vmem:[#allocation2 + $0x190] sm:$0xff] %v4177_v29  ;;  %v4181_v35 = vpack.c.bf16 %v1282_v31, %v1280_v25  ;;  %3474 = vst [vmem:[#allocation2 + $0x198] sm:$0xff] %v4178_v34  ;;  %v4182_v42 = vpack.c.bf16 %v1635_v33, %v1633_v30 }
 0x218   :  { %3477 = vst [vmem:[#allocation2 + $0x1b0] sm:$0xff] %v4181_v35  ;;  %v1285_v43 = vpop.f32.mrb[156].mxu0  ;;  %3478 = vst [vmem:[#allocation2 + $0x1b8] sm:$0xff] %v4182_v42  ;;  %v1638_v45 = vpop.f32.mrb[156].mxu1 }
 0x219   :  { %v1286_v44 = vadd.f32 %v1285_v43, %v5258_v60  ;;  %v1287_v38 = vpop.f32.mrb[157].mxu0  ;;  %v1639_v46 = vadd.f32 %v1638_v45, %v5261_v5  ;;  %v1640_v41 = vpop.f32.mrb[157].mxu1 }
 0x21a   :  { %v1288_v47 = vadd.f32 %v1287_v38, %v5263_v10  ;;  %v1289_v48 = vpop.f32.mrb[158].mxu0  ;;  %v1641_v49 = vadd.f32 %v1640_v41, %v5266_v11  ;;  %v1642_v51 = vpop.f32.mrb[158].mxu1 }
 0x21b   :  { %v1290_v50 = vadd.f32 %v1289_v48, %v5258_v60  ;;  %v1291_v8 = vpop.f32.mrb[159].mxu0  ;;  %v1643_v52 = vadd.f32 %v1642_v51, %v5261_v5  ;;  %v1644_v54 = vpop.f32.mrb[159].mxu1 }
 0x21c   :  { %v4185_v23 = vpack.c.bf16 %v1288_v47, %v1286_v44  ;;  %v1292_v53 = vadd.f32 %v1291_v8, %v5263_v10  ;;  %v4186_v55 = vpack.c.bf16 %v1641_v49, %v1639_v46  ;;  %v1645_v56 = vadd.f32 %v1644_v54, %v5266_v11 }
 0x21e   :  { %3481 = vst [vmem:[#allocation2 + $0x1d0] sm:$0xff] %v4185_v23  ;;  %v4189_v57 = vpack.c.bf16 %v1292_v53, %v1290_v50  ;;  %3482 = vst [vmem:[#allocation2 + $0x1d8] sm:$0xff] %v4186_v55  ;;  %v4190_v58 = vpack.c.bf16 %v1645_v56, %v1643_v52 }
 0x220   :  { %3485 = vst [vmem:[#allocation2 + $0x1f0] sm:$0xff] %v4189_v57  ;;  %v1295_v36 = vpop.f32.mrb[160].mxu0  ;;  %3486 = vst [vmem:[#allocation2 + $0x1f8] sm:$0xff] %v4190_v58  ;;  %v1648_v61 = vpop.f32.mrb[160].mxu1 }
 0x221   :  { %v1296_v59 = vadd.f32 %v1295_v36, %v5258_v60  ;;  %v1297_v62 = vpop.f32.mrb[161].mxu0  ;;  %v1649_v63 = vadd.f32 %v1648_v61, %v5261_v5  ;;  %v1650_v0 = vpop.f32.mrb[161].mxu1 }
 0x222   :  { %v1298_v39 = vadd.f32 %v1297_v62, %v5263_v10  ;;  %v1299_v1 = vpop.f32.mrb[162].mxu0  ;;  %v1651_v2 = vadd.f32 %v1650_v0, %v5266_v11  ;;  %v1652_v9 = vpop.f32.mrb[162].mxu1 }
 0x223   :  { %v1300_v7 = vadd.f32 %v1299_v1, %v5258_v60  ;;  %v1301_v3 = vpop.f32.mrb[163].mxu0  ;;  %v1653_v6 = vadd.f32 %v1652_v9, %v5261_v5  ;;  %v1654_v26 = vpop.f32.mrb[163].mxu1 }
 0x224   :  { %v4193_v4 = vpack.c.bf16 %v1298_v39, %v1296_v59  ;;  %v1302_v12 = vadd.f32 %v1301_v3, %v5263_v10  ;;  %v4194_v13 = vpack.c.bf16 %v1651_v2, %v1649_v63  ;;  %v1655_v14 = vadd.f32 %v1654_v26, %v5266_v11 }
 0x226   :  { %3489 = vst [vmem:[#allocation2 + $0x210] sm:$0xff] %v4193_v4  ;;  %v4197_v15 = vpack.c.bf16 %v1302_v12, %v1300_v7  ;;  %3490 = vst [vmem:[#allocation2 + $0x218] sm:$0xff] %v4194_v13  ;;  %v4198_v16 = vpack.c.bf16 %v1655_v14, %v1653_v6 }
 0x228   :  { %3493 = vst [vmem:[#allocation2 + $0x230] sm:$0xff] %v4197_v15  ;;  %v1305_v17 = vpop.f32.mrb[164].mxu0  ;;  %3494 = vst [vmem:[#allocation2 + $0x238] sm:$0xff] %v4198_v16  ;;  %v1658_v37 = vpop.f32.mrb[164].mxu1 }
 0x229   :  { %v1306_v18 = vadd.f32 %v1305_v17, %v5258_v60  ;;  %v1307_v19 = vpop.f32.mrb[165].mxu0  ;;  %v1659_v20 = vadd.f32 %v1658_v37, %v5261_v5  ;;  %v1660_v40 = vpop.f32.mrb[165].mxu1 }
 0x22a   :  { %v1308_v21 = vadd.f32 %v1307_v19, %v5263_v10  ;;  %v1309_v22 = vpop.f32.mrb[166].mxu0  ;;  %v1661_v24 = vadd.f32 %v1660_v40, %v5266_v11  ;;  %v1662_v27 = vpop.f32.mrb[166].mxu1 }
 0x22b   :  { %v1310_v25 = vadd.f32 %v1309_v22, %v5258_v60  ;;  %v1311_v28 = vpop.f32.mrb[167].mxu0  ;;  %v1663_v30 = vadd.f32 %v1662_v27, %v5261_v5  ;;  %v1664_v32 = vpop.f32.mrb[167].mxu1 }
 0x22c   :  { %v4201_v29 = vpack.c.bf16 %v1308_v21, %v1306_v18  ;;  %v1312_v31 = vadd.f32 %v1311_v28, %v5263_v10  ;;  %v4202_v34 = vpack.c.bf16 %v1661_v24, %v1659_v20  ;;  %v1665_v33 = vadd.f32 %v1664_v32, %v5266_v11 }
 0x22e   :  { %3497 = vst [vmem:[#allocation2 + $0x250] sm:$0xff] %v4201_v29  ;;  %v4205_v35 = vpack.c.bf16 %v1312_v31, %v1310_v25  ;;  %3498 = vst [vmem:[#allocation2 + $0x258] sm:$0xff] %v4202_v34  ;;  %v4206_v42 = vpack.c.bf16 %v1665_v33, %v1663_v30 }
 0x230   :  { %3501 = vst [vmem:[#allocation2 + $0x270] sm:$0xff] %v4205_v35  ;;  %v1315_v43 = vpop.f32.mrb[168].mxu0  ;;  %3502 = vst [vmem:[#allocation2 + $0x278] sm:$0xff] %v4206_v42  ;;  %v1668_v45 = vpop.f32.mrb[168].mxu1 }
 0x231   :  { %v1316_v44 = vadd.f32 %v1315_v43, %v5258_v60  ;;  %v1317_v38 = vpop.f32.mrb[169].mxu0  ;;  %v1669_v46 = vadd.f32 %v1668_v45, %v5261_v5  ;;  %v1670_v41 = vpop.f32.mrb[169].mxu1 }
 0x232   :  { %v1318_v47 = vadd.f32 %v1317_v38, %v5263_v10  ;;  %v1319_v48 = vpop.f32.mrb[170].mxu0  ;;  %v1671_v49 = vadd.f32 %v1670_v41, %v5266_v11  ;;  %v1672_v51 = vpop.f32.mrb[170].mxu1 }
 0x233   :  { %v1320_v50 = vadd.f32 %v1319_v48, %v5258_v60  ;;  %v1321_v8 = vpop.f32.mrb[171].mxu0  ;;  %v1673_v52 = vadd.f32 %v1672_v51, %v5261_v5  ;;  %v1674_v54 = vpop.f32.mrb[171].mxu1 }
 0x234   :  { %v4209_v23 = vpack.c.bf16 %v1318_v47, %v1316_v44  ;;  %v1322_v53 = vadd.f32 %v1321_v8, %v5263_v10  ;;  %v4210_v55 = vpack.c.bf16 %v1671_v49, %v1669_v46  ;;  %v1675_v56 = vadd.f32 %v1674_v54, %v5266_v11 }
 0x236   :  { %3505 = vst [vmem:[#allocation2 + $0x290] sm:$0xff] %v4209_v23  ;;  %v4213_v57 = vpack.c.bf16 %v1322_v53, %v1320_v50  ;;  %3506 = vst [vmem:[#allocation2 + $0x298] sm:$0xff] %v4210_v55  ;;  %v4214_v58 = vpack.c.bf16 %v1675_v56, %v1673_v52 }
 0x238   :  { %3509 = vst [vmem:[#allocation2 + $0x2b0] sm:$0xff] %v4213_v57  ;;  %v1325_v36 = vpop.f32.mrb[172].mxu0  ;;  %3510 = vst [vmem:[#allocation2 + $0x2b8] sm:$0xff] %v4214_v58  ;;  %v1678_v61 = vpop.f32.mrb[172].mxu1 }
 0x239   :  { %v1326_v59 = vadd.f32 %v1325_v36, %v5258_v60  ;;  %v1327_v62 = vpop.f32.mrb[173].mxu0  ;;  %v1679_v63 = vadd.f32 %v1678_v61, %v5261_v5  ;;  %v1680_v0 = vpop.f32.mrb[173].mxu1 }
 0x23a   :  { %v1328_v39 = vadd.f32 %v1327_v62, %v5263_v10  ;;  %v1329_v1 = vpop.f32.mrb[174].mxu0  ;;  %v1681_v2 = vadd.f32 %v1680_v0, %v5266_v11  ;;  %v1682_v9 = vpop.f32.mrb[174].mxu1 }
 0x23b   :  { %v1330_v7 = vadd.f32 %v1329_v1, %v5258_v60  ;;  %v1331_v3 = vpop.f32.mrb[175].mxu0  ;;  %v1683_v6 = vadd.f32 %v1682_v9, %v5261_v5  ;;  %v1684_v26 = vpop.f32.mrb[175].mxu1 }
 0x23c   :  { %v4217_v4 = vpack.c.bf16 %v1328_v39, %v1326_v59  ;;  %v1332_v12 = vadd.f32 %v1331_v3, %v5263_v10  ;;  %v4218_v13 = vpack.c.bf16 %v1681_v2, %v1679_v63  ;;  %v1685_v14 = vadd.f32 %v1684_v26, %v5266_v11 }
 0x23e   :  { %3513 = vst [vmem:[#allocation2 + $0x2d0] sm:$0xff] %v4217_v4  ;;  %v4221_v15 = vpack.c.bf16 %v1332_v12, %v1330_v7  ;;  %3514 = vst [vmem:[#allocation2 + $0x2d8] sm:$0xff] %v4218_v13  ;;  %v4222_v16 = vpack.c.bf16 %v1685_v14, %v1683_v6 }
 0x240   :  { %3517 = vst [vmem:[#allocation2 + $0x2f0] sm:$0xff] %v4221_v15  ;;  %v1335_v17 = vpop.f32.mrb[176].mxu0  ;;  %3518 = vst [vmem:[#allocation2 + $0x2f8] sm:$0xff] %v4222_v16  ;;  %v1688_v37 = vpop.f32.mrb[176].mxu1 }
 0x241   :  { %v1336_v18 = vadd.f32 %v1335_v17, %v5258_v60  ;;  %v1337_v19 = vpop.f32.mrb[177].mxu0  ;;  %v1689_v20 = vadd.f32 %v1688_v37, %v5261_v5  ;;  %v1690_v40 = vpop.f32.mrb[177].mxu1 }
 0x242   :  { %v1338_v21 = vadd.f32 %v1337_v19, %v5263_v10  ;;  %v1339_v22 = vpop.f32.mrb[178].mxu0  ;;  %v1691_v24 = vadd.f32 %v1690_v40, %v5266_v11  ;;  %v1692_v27 = vpop.f32.mrb[178].mxu1 }
 0x243   :  { %v1340_v25 = vadd.f32 %v1339_v22, %v5258_v60  ;;  %v1341_v28 = vpop.f32.mrb[179].mxu0  ;;  %v1693_v30 = vadd.f32 %v1692_v27, %v5261_v5  ;;  %v1694_v32 = vpop.f32.mrb[179].mxu1 }
 0x244   :  { %v4225_v29 = vpack.c.bf16 %v1338_v21, %v1336_v18  ;;  %v1342_v31 = vadd.f32 %v1341_v28, %v5263_v10  ;;  %v4226_v34 = vpack.c.bf16 %v1691_v24, %v1689_v20  ;;  %v1695_v33 = vadd.f32 %v1694_v32, %v5266_v11 }
 0x246   :  { %3521 = vst [vmem:[#allocation2 + $0x310] sm:$0xff] %v4225_v29  ;;  %v4229_v35 = vpack.c.bf16 %v1342_v31, %v1340_v25  ;;  %3522 = vst [vmem:[#allocation2 + $0x318] sm:$0xff] %v4226_v34  ;;  %v4230_v42 = vpack.c.bf16 %v1695_v33, %v1693_v30 }
 0x248   :  { %3525 = vst [vmem:[#allocation2 + $0x330] sm:$0xff] %v4229_v35  ;;  %v1345_v43 = vpop.f32.mrb[180].mxu0  ;;  %3526 = vst [vmem:[#allocation2 + $0x338] sm:$0xff] %v4230_v42  ;;  %v1698_v45 = vpop.f32.mrb[180].mxu1 }
 0x249   :  { %v1346_v44 = vadd.f32 %v1345_v43, %v5258_v60  ;;  %v1347_v38 = vpop.f32.mrb[181].mxu0  ;;  %v1699_v46 = vadd.f32 %v1698_v45, %v5261_v5  ;;  %v1700_v41 = vpop.f32.mrb[181].mxu1 }
 0x24a   :  { %v1348_v47 = vadd.f32 %v1347_v38, %v5263_v10  ;;  %v1349_v48 = vpop.f32.mrb[182].mxu0  ;;  %v1701_v49 = vadd.f32 %v1700_v41, %v5266_v11  ;;  %v1702_v51 = vpop.f32.mrb[182].mxu1 }
 0x24b   :  { %v1350_v50 = vadd.f32 %v1349_v48, %v5258_v60  ;;  %v1351_v8 = vpop.f32.mrb[183].mxu0  ;;  %v1703_v52 = vadd.f32 %v1702_v51, %v5261_v5  ;;  %v1704_v54 = vpop.f32.mrb[183].mxu1 }
 0x24c   :  { %v4233_v23 = vpack.c.bf16 %v1348_v47, %v1346_v44  ;;  %v1352_v53 = vadd.f32 %v1351_v8, %v5263_v10  ;;  %v4234_v55 = vpack.c.bf16 %v1701_v49, %v1699_v46  ;;  %v1705_v56 = vadd.f32 %v1704_v54, %v5266_v11 }
 0x24e   :  { %3529 = vst [vmem:[#allocation2 + $0x350] sm:$0xff] %v4233_v23  ;;  %v4237_v57 = vpack.c.bf16 %v1352_v53, %v1350_v50  ;;  %3530 = vst [vmem:[#allocation2 + $0x358] sm:$0xff] %v4234_v55  ;;  %v4238_v58 = vpack.c.bf16 %v1705_v56, %v1703_v52 }
 0x250   :  { %3533 = vst [vmem:[#allocation2 + $0x370] sm:$0xff] %v4237_v57  ;;  %v1355_v36 = vpop.f32.mrb[184].mxu0  ;;  %3534 = vst [vmem:[#allocation2 + $0x378] sm:$0xff] %v4238_v58  ;;  %v1708_v61 = vpop.f32.mrb[184].mxu1 }
 0x251   :  { %v1356_v59 = vadd.f32 %v1355_v36, %v5258_v60  ;;  %v1357_v62 = vpop.f32.mrb[185].mxu0  ;;  %v1709_v63 = vadd.f32 %v1708_v61, %v5261_v5  ;;  %v1710_v0 = vpop.f32.mrb[185].mxu1 }
 0x252   :  { %v1358_v39 = vadd.f32 %v1357_v62, %v5263_v10  ;;  %v1359_v1 = vpop.f32.mrb[186].mxu0  ;;  %v1711_v2 = vadd.f32 %v1710_v0, %v5266_v11  ;;  %v1712_v9 = vpop.f32.mrb[186].mxu1 }
 0x253   :  { %v1360_v7 = vadd.f32 %v1359_v1, %v5258_v60  ;;  %v1361_v3 = vpop.f32.mrb[187].mxu0  ;;  %v1713_v6 = vadd.f32 %v1712_v9, %v5261_v5  ;;  %v1714_v26 = vpop.f32.mrb[187].mxu1 }
 0x254   :  { %v4241_v4 = vpack.c.bf16 %v1358_v39, %v1356_v59  ;;  %v1362_v12 = vadd.f32 %v1361_v3, %v5263_v10  ;;  %v4242_v13 = vpack.c.bf16 %v1711_v2, %v1709_v63  ;;  %v1715_v14 = vadd.f32 %v1714_v26, %v5266_v11 }
 0x256   :  { %3537 = vst [vmem:[#allocation2 + $0x390] sm:$0xff] %v4241_v4  ;;  %v4245_v15 = vpack.c.bf16 %v1362_v12, %v1360_v7  ;;  %3538 = vst [vmem:[#allocation2 + $0x398] sm:$0xff] %v4242_v13  ;;  %v4246_v16 = vpack.c.bf16 %v1715_v14, %v1713_v6 }
 0x258   :  { %3541 = vst [vmem:[#allocation2 + $0x3b0] sm:$0xff] %v4245_v15  ;;  %v1365_v17 = vpop.f32.mrb[188].mxu0  ;;  %3542 = vst [vmem:[#allocation2 + $0x3b8] sm:$0xff] %v4246_v16  ;;  %v1718_v37 = vpop.f32.mrb[188].mxu1 }
 0x259   :  { %v1366_v18 = vadd.f32 %v1365_v17, %v5258_v60  ;;  %v1367_v19 = vpop.f32.mrb[189].mxu0  ;;  %v1719_v20 = vadd.f32 %v1718_v37, %v5261_v5  ;;  %v1720_v40 = vpop.f32.mrb[189].mxu1 }
 0x25a   :  { %v1368_v21 = vadd.f32 %v1367_v19, %v5263_v10  ;;  %v1369_v22 = vpop.f32.mrb[190].mxu0  ;;  %v1721_v24 = vadd.f32 %v1720_v40, %v5266_v11  ;;  %v1722_v27 = vpop.f32.mrb[190].mxu1 }
 0x25b   :  { %v1370_v25 = vadd.f32 %v1369_v22, %v5258_v60  ;;  %v1371_v28 = vpop.f32.mrb[191].mxu0  ;;  %v1723_v30 = vadd.f32 %v1722_v27, %v5261_v5  ;;  %v1724_v32 = vpop.f32.mrb[191].mxu1 }
 0x25c   :  { %v4249_v29 = vpack.c.bf16 %v1368_v21, %v1366_v18  ;;  %v1372_v31 = vadd.f32 %v1371_v28, %v5263_v10  ;;  %v4250_v34 = vpack.c.bf16 %v1721_v24, %v1719_v20  ;;  %v1725_v33 = vadd.f32 %v1724_v32, %v5266_v11 }
 0x25e   :  { %3545 = vst [vmem:[#allocation2 + $0x3d0] sm:$0xff] %v4249_v29  ;;  %v4253_v35 = vpack.c.bf16 %v1372_v31, %v1370_v25  ;;  %3546 = vst [vmem:[#allocation2 + $0x3d8] sm:$0xff] %v4250_v34  ;;  %v4254_v42 = vpack.c.bf16 %v1725_v33, %v1723_v30 }
 0x260   :  { %3549 = vst [vmem:[#allocation2 + $0x3f0] sm:$0xff] %v4253_v35  ;;  %v1375_v43 = vpop.f32.mrb[192].mxu0  ;;  %3550 = vst [vmem:[#allocation2 + $0x3f8] sm:$0xff] %v4254_v42  ;;  %v1728_v45 = vpop.f32.mrb[192].mxu1 }
 0x261   :  { %v1376_v44 = vadd.f32 %v1375_v43, %v5258_v60  ;;  %v1377_v38 = vpop.f32.mrb[193].mxu0  ;;  %v1729_v46 = vadd.f32 %v1728_v45, %v5261_v5  ;;  %v1730_v41 = vpop.f32.mrb[193].mxu1 }
 0x262   :  { %v1378_v47 = vadd.f32 %v1377_v38, %v5263_v10  ;;  %v1379_v48 = vpop.f32.mrb[194].mxu0  ;;  %v1731_v49 = vadd.f32 %v1730_v41, %v5266_v11  ;;  %v1732_v51 = vpop.f32.mrb[194].mxu1 }
 0x263   :  { %v1380_v50 = vadd.f32 %v1379_v48, %v5258_v60  ;;  %v1381_v8 = vpop.f32.mrb[195].mxu0  ;;  %v1733_v52 = vadd.f32 %v1732_v51, %v5261_v5  ;;  %v1734_v54 = vpop.f32.mrb[195].mxu1 }
 0x264   :  { %v4257_v23 = vpack.c.bf16 %v1378_v47, %v1376_v44  ;;  %v1382_v53 = vadd.f32 %v1381_v8, %v5263_v10  ;;  %v4258_v55 = vpack.c.bf16 %v1731_v49, %v1729_v46  ;;  %v1735_v56 = vadd.f32 %v1734_v54, %v5266_v11 }
 0x266   :  { %3553 = vst [vmem:[#allocation2 + $0x410] sm:$0xff] %v4257_v23  ;;  %v4261_v57 = vpack.c.bf16 %v1382_v53, %v1380_v50  ;;  %3554 = vst [vmem:[#allocation2 + $0x418] sm:$0xff] %v4258_v55  ;;  %v4262_v58 = vpack.c.bf16 %v1735_v56, %v1733_v52 }
 0x268   :  { %3557 = vst [vmem:[#allocation2 + $0x430] sm:$0xff] %v4261_v57  ;;  %v1385_v36 = vpop.f32.mrb[196].mxu0  ;;  %3558 = vst [vmem:[#allocation2 + $0x438] sm:$0xff] %v4262_v58  ;;  %v1738_v61 = vpop.f32.mrb[196].mxu1 }
 0x269   :  { %v1386_v59 = vadd.f32 %v1385_v36, %v5258_v60  ;;  %v1387_v62 = vpop.f32.mrb[197].mxu0  ;;  %v1739_v63 = vadd.f32 %v1738_v61, %v5261_v5  ;;  %v1740_v0 = vpop.f32.mrb[197].mxu1 }
 0x26a   :  { %v1388_v39 = vadd.f32 %v1387_v62, %v5263_v10  ;;  %v1389_v1 = vpop.f32.mrb[198].mxu0  ;;  %v1741_v2 = vadd.f32 %v1740_v0, %v5266_v11  ;;  %v1742_v9 = vpop.f32.mrb[198].mxu1 }
 0x26b   :  { %v1390_v7 = vadd.f32 %v1389_v1, %v5258_v60  ;;  %v1391_v3 = vpop.f32.mrb[199].mxu0  ;;  %v1743_v6 = vadd.f32 %v1742_v9, %v5261_v5  ;;  %v1744_v26 = vpop.f32.mrb[199].mxu1 }
 0x26c   :  { %v4265_v4 = vpack.c.bf16 %v1388_v39, %v1386_v59  ;;  %v1392_v12 = vadd.f32 %v1391_v3, %v5263_v10  ;;  %v4266_v13 = vpack.c.bf16 %v1741_v2, %v1739_v63  ;;  %v1745_v14 = vadd.f32 %v1744_v26, %v5266_v11 }
 0x26e   :  { %3561 = vst [vmem:[#allocation2 + $0x450] sm:$0xff] %v4265_v4  ;;  %v4269_v15 = vpack.c.bf16 %v1392_v12, %v1390_v7  ;;  %3562 = vst [vmem:[#allocation2 + $0x458] sm:$0xff] %v4266_v13  ;;  %v4270_v16 = vpack.c.bf16 %v1745_v14, %v1743_v6 }
 0x270   :  { %3565 = vst [vmem:[#allocation2 + $0x470] sm:$0xff] %v4269_v15  ;;  %v1395_v17 = vpop.f32.mrb[200].mxu0  ;;  %3566 = vst [vmem:[#allocation2 + $0x478] sm:$0xff] %v4270_v16  ;;  %v1748_v37 = vpop.f32.mrb[200].mxu1 }
 0x271   :  { %v1396_v18 = vadd.f32 %v1395_v17, %v5258_v60  ;;  %v1397_v19 = vpop.f32.mrb[201].mxu0  ;;  %v1749_v20 = vadd.f32 %v1748_v37, %v5261_v5  ;;  %v1750_v40 = vpop.f32.mrb[201].mxu1 }
 0x272   :  { %v1398_v21 = vadd.f32 %v1397_v19, %v5263_v10  ;;  %v1399_v22 = vpop.f32.mrb[202].mxu0  ;;  %v1751_v24 = vadd.f32 %v1750_v40, %v5266_v11  ;;  %v1752_v27 = vpop.f32.mrb[202].mxu1 }
 0x273   :  { %v1400_v25 = vadd.f32 %v1399_v22, %v5258_v60  ;;  %v1401_v28 = vpop.f32.mrb[203].mxu0  ;;  %v1753_v30 = vadd.f32 %v1752_v27, %v5261_v5  ;;  %v1754_v32 = vpop.f32.mrb[203].mxu1 }
 0x274   :  { %v4273_v29 = vpack.c.bf16 %v1398_v21, %v1396_v18  ;;  %v1402_v31 = vadd.f32 %v1401_v28, %v5263_v10  ;;  %v4274_v34 = vpack.c.bf16 %v1751_v24, %v1749_v20  ;;  %v1755_v33 = vadd.f32 %v1754_v32, %v5266_v11 }
 0x276   :  { %3569 = vst [vmem:[#allocation2 + $0x490] sm:$0xff] %v4273_v29  ;;  %v4277_v35 = vpack.c.bf16 %v1402_v31, %v1400_v25  ;;  %3570 = vst [vmem:[#allocation2 + $0x498] sm:$0xff] %v4274_v34  ;;  %v4278_v42 = vpack.c.bf16 %v1755_v33, %v1753_v30 }
 0x278   :  { %3573 = vst [vmem:[#allocation2 + $0x4b0] sm:$0xff] %v4277_v35  ;;  %v1405_v43 = vpop.f32.mrb[204].mxu0  ;;  %3574 = vst [vmem:[#allocation2 + $0x4b8] sm:$0xff] %v4278_v42  ;;  %v1758_v45 = vpop.f32.mrb[204].mxu1 }
 0x279   :  { %v1406_v44 = vadd.f32 %v1405_v43, %v5258_v60  ;;  %v1407_v38 = vpop.f32.mrb[205].mxu0  ;;  %v1759_v46 = vadd.f32 %v1758_v45, %v5261_v5  ;;  %v1760_v41 = vpop.f32.mrb[205].mxu1 }
 0x27a   :  { %v1408_v47 = vadd.f32 %v1407_v38, %v5263_v10  ;;  %v1409_v48 = vpop.f32.mrb[206].mxu0  ;;  %v1761_v49 = vadd.f32 %v1760_v41, %v5266_v11  ;;  %v1762_v51 = vpop.f32.mrb[206].mxu1 }
 0x27b   :  { %v1410_v50 = vadd.f32 %v1409_v48, %v5258_v60  ;;  %v1411_v8 = vpop.f32.mrb[207].mxu0  ;;  %v1763_v52 = vadd.f32 %v1762_v51, %v5261_v5  ;;  %v1764_v54 = vpop.f32.mrb[207].mxu1 }
 0x27c   :  { %v4281_v23 = vpack.c.bf16 %v1408_v47, %v1406_v44  ;;  %v1412_v53 = vadd.f32 %v1411_v8, %v5263_v10  ;;  %v4282_v55 = vpack.c.bf16 %v1761_v49, %v1759_v46  ;;  %v1765_v56 = vadd.f32 %v1764_v54, %v5266_v11 }
 0x27e   :  { %3577 = vst [vmem:[#allocation2 + $0x4d0] sm:$0xff] %v4281_v23  ;;  %v4285_v57 = vpack.c.bf16 %v1412_v53, %v1410_v50  ;;  %3578 = vst [vmem:[#allocation2 + $0x4d8] sm:$0xff] %v4282_v55  ;;  %v4286_v58 = vpack.c.bf16 %v1765_v56, %v1763_v52 }
 0x280   :  { %3581 = vst [vmem:[#allocation2 + $0x4f0] sm:$0xff] %v4285_v57  ;;  %v1415_v36 = vpop.f32.mrb[208].mxu0  ;;  %3582 = vst [vmem:[#allocation2 + $0x4f8] sm:$0xff] %v4286_v58  ;;  %v1768_v61 = vpop.f32.mrb[208].mxu1 }
 0x281   :  { %v1416_v59 = vadd.f32 %v1415_v36, %v5258_v60  ;;  %v1417_v62 = vpop.f32.mrb[209].mxu0  ;;  %v1769_v63 = vadd.f32 %v1768_v61, %v5261_v5  ;;  %v1770_v0 = vpop.f32.mrb[209].mxu1 }
 0x282   :  { %v1418_v39 = vadd.f32 %v1417_v62, %v5263_v10  ;;  %v1419_v1 = vpop.f32.mrb[210].mxu0  ;;  %v1771_v2 = vadd.f32 %v1770_v0, %v5266_v11  ;;  %v1772_v9 = vpop.f32.mrb[210].mxu1 }
 0x283   :  { %v1420_v7 = vadd.f32 %v1419_v1, %v5258_v60  ;;  %v1421_v3 = vpop.f32.mrb[211].mxu0  ;;  %v1773_v6 = vadd.f32 %v1772_v9, %v5261_v5  ;;  %v1774_v26 = vpop.f32.mrb[211].mxu1 }
 0x284   :  { %v4289_v4 = vpack.c.bf16 %v1418_v39, %v1416_v59  ;;  %v1422_v12 = vadd.f32 %v1421_v3, %v5263_v10  ;;  %v4290_v13 = vpack.c.bf16 %v1771_v2, %v1769_v63  ;;  %v1775_v14 = vadd.f32 %v1774_v26, %v5266_v11 }
 0x286   :  { %3585 = vst [vmem:[#allocation2 + $0x510] sm:$0xff] %v4289_v4  ;;  %v4293_v15 = vpack.c.bf16 %v1422_v12, %v1420_v7  ;;  %3586 = vst [vmem:[#allocation2 + $0x518] sm:$0xff] %v4290_v13  ;;  %v4294_v16 = vpack.c.bf16 %v1775_v14, %v1773_v6 }
 0x288   :  { %3589 = vst [vmem:[#allocation2 + $0x530] sm:$0xff] %v4293_v15  ;;  %v1425_v17 = vpop.f32.mrb[212].mxu0  ;;  %3590 = vst [vmem:[#allocation2 + $0x538] sm:$0xff] %v4294_v16  ;;  %v1778_v37 = vpop.f32.mrb[212].mxu1 }
 0x289   :  { %v1426_v18 = vadd.f32 %v1425_v17, %v5258_v60  ;;  %v1427_v19 = vpop.f32.mrb[213].mxu0  ;;  %v1779_v20 = vadd.f32 %v1778_v37, %v5261_v5  ;;  %v1780_v40 = vpop.f32.mrb[213].mxu1 }
 0x28a   :  { %v1428_v21 = vadd.f32 %v1427_v19, %v5263_v10  ;;  %v1429_v22 = vpop.f32.mrb[214].mxu0  ;;  %v1781_v24 = vadd.f32 %v1780_v40, %v5266_v11  ;;  %v1782_v27 = vpop.f32.mrb[214].mxu1 }
 0x28b   :  { %v1430_v25 = vadd.f32 %v1429_v22, %v5258_v60  ;;  %v1431_v28 = vpop.f32.mrb[215].mxu0  ;;  %v1783_v30 = vadd.f32 %v1782_v27, %v5261_v5  ;;  %v1784_v32 = vpop.f32.mrb[215].mxu1 }
 0x28c   :  { %v4297_v29 = vpack.c.bf16 %v1428_v21, %v1426_v18  ;;  %v1432_v31 = vadd.f32 %v1431_v28, %v5263_v10  ;;  %v4298_v34 = vpack.c.bf16 %v1781_v24, %v1779_v20  ;;  %v1785_v33 = vadd.f32 %v1784_v32, %v5266_v11 }
 0x28e   :  { %3593 = vst [vmem:[#allocation2 + $0x550] sm:$0xff] %v4297_v29  ;;  %v4301_v35 = vpack.c.bf16 %v1432_v31, %v1430_v25  ;;  %3594 = vst [vmem:[#allocation2 + $0x558] sm:$0xff] %v4298_v34  ;;  %v4302_v42 = vpack.c.bf16 %v1785_v33, %v1783_v30 }
 0x290   :  { %3597 = vst [vmem:[#allocation2 + $0x570] sm:$0xff] %v4301_v35  ;;  %v1435_v43 = vpop.f32.mrb[216].mxu0  ;;  %3598 = vst [vmem:[#allocation2 + $0x578] sm:$0xff] %v4302_v42  ;;  %v1788_v45 = vpop.f32.mrb[216].mxu1 }
 0x291   :  { %v1436_v44 = vadd.f32 %v1435_v43, %v5258_v60  ;;  %v1437_v38 = vpop.f32.mrb[217].mxu0  ;;  %v1789_v46 = vadd.f32 %v1788_v45, %v5261_v5  ;;  %v1790_v41 = vpop.f32.mrb[217].mxu1 }
 0x292   :  { %v1438_v47 = vadd.f32 %v1437_v38, %v5263_v10  ;;  %v1439_v48 = vpop.f32.mrb[218].mxu0  ;;  %v1791_v49 = vadd.f32 %v1790_v41, %v5266_v11  ;;  %v1792_v51 = vpop.f32.mrb[218].mxu1 }
 0x293   :  { %v1440_v50 = vadd.f32 %v1439_v48, %v5258_v60  ;;  %v1441_v8 = vpop.f32.mrb[219].mxu0  ;;  %v1793_v52 = vadd.f32 %v1792_v51, %v5261_v5  ;;  %v1794_v54 = vpop.f32.mrb[219].mxu1 }
 0x294   :  { %v4305_v23 = vpack.c.bf16 %v1438_v47, %v1436_v44  ;;  %v1442_v53 = vadd.f32 %v1441_v8, %v5263_v10  ;;  %v4306_v55 = vpack.c.bf16 %v1791_v49, %v1789_v46  ;;  %v1795_v56 = vadd.f32 %v1794_v54, %v5266_v11 }
 0x296   :  { %3601 = vst [vmem:[#allocation2 + $0x590] sm:$0xff] %v4305_v23  ;;  %v4309_v57 = vpack.c.bf16 %v1442_v53, %v1440_v50  ;;  %3602 = vst [vmem:[#allocation2 + $0x598] sm:$0xff] %v4306_v55  ;;  %v4310_v58 = vpack.c.bf16 %v1795_v56, %v1793_v52 }
 0x298   :  { %3605 = vst [vmem:[#allocation2 + $0x5b0] sm:$0xff] %v4309_v57  ;;  %v1445_v36 = vpop.f32.mrb[220].mxu0  ;;  %3606 = vst [vmem:[#allocation2 + $0x5b8] sm:$0xff] %v4310_v58  ;;  %v1798_v61 = vpop.f32.mrb[220].mxu1 }
 0x299   :  { %v1446_v59 = vadd.f32 %v1445_v36, %v5258_v60  ;;  %v1447_v62 = vpop.f32.mrb[221].mxu0  ;;  %v1799_v63 = vadd.f32 %v1798_v61, %v5261_v5  ;;  %v1800_v0 = vpop.f32.mrb[221].mxu1 }
 0x29a   :  { %v1448_v39 = vadd.f32 %v1447_v62, %v5263_v10  ;;  %v1449_v1 = vpop.f32.mrb[222].mxu0  ;;  %v1801_v2 = vadd.f32 %v1800_v0, %v5266_v11  ;;  %v1802_v9 = vpop.f32.mrb[222].mxu1 }
 0x29b   :  { %v1450_v7 = vadd.f32 %v1449_v1, %v5258_v60  ;;  %v1451_v3 = vpop.f32.mrb[223].mxu0  ;;  %v1803_v6 = vadd.f32 %v1802_v9, %v5261_v5  ;;  %v1804_v26 = vpop.f32.mrb[223].mxu1 }
 0x29c   :  { %v4313_v4 = vpack.c.bf16 %v1448_v39, %v1446_v59  ;;  %v1452_v12 = vadd.f32 %v1451_v3, %v5263_v10  ;;  %v4314_v13 = vpack.c.bf16 %v1801_v2, %v1799_v63  ;;  %v1805_v14 = vadd.f32 %v1804_v26, %v5266_v11 }
 0x29e   :  { %3609 = vst [vmem:[#allocation2 + $0x5d0] sm:$0xff] %v4313_v4  ;;  %v4317_v15 = vpack.c.bf16 %v1452_v12, %v1450_v7  ;;  %3610 = vst [vmem:[#allocation2 + $0x5d8] sm:$0xff] %v4314_v13  ;;  %v4318_v16 = vpack.c.bf16 %v1805_v14, %v1803_v6 }
 0x2a0   :  { %3613 = vst [vmem:[#allocation2 + $0x5f0] sm:$0xff] %v4317_v15  ;;  %v1455_v17 = vpop.f32.mrb[224].mxu0  ;;  %3614 = vst [vmem:[#allocation2 + $0x5f8] sm:$0xff] %v4318_v16  ;;  %v1808_v37 = vpop.f32.mrb[224].mxu1 }
 0x2a1   :  { %v1456_v18 = vadd.f32 %v1455_v17, %v5258_v60  ;;  %v1457_v19 = vpop.f32.mrb[225].mxu0  ;;  %v1809_v20 = vadd.f32 %v1808_v37, %v5261_v5  ;;  %v1810_v40 = vpop.f32.mrb[225].mxu1 }
 0x2a2   :  { %v1458_v21 = vadd.f32 %v1457_v19, %v5263_v10  ;;  %v1459_v22 = vpop.f32.mrb[226].mxu0  ;;  %v1811_v24 = vadd.f32 %v1810_v40, %v5266_v11  ;;  %v1812_v27 = vpop.f32.mrb[226].mxu1 }
 0x2a3   :  { %v1460_v25 = vadd.f32 %v1459_v22, %v5258_v60  ;;  %v1461_v28 = vpop.f32.mrb[227].mxu0  ;;  %v1813_v30 = vadd.f32 %v1812_v27, %v5261_v5  ;;  %v1814_v32 = vpop.f32.mrb[227].mxu1 }
 0x2a4   :  { %v4321_v29 = vpack.c.bf16 %v1458_v21, %v1456_v18  ;;  %v1462_v31 = vadd.f32 %v1461_v28, %v5263_v10  ;;  %v4322_v34 = vpack.c.bf16 %v1811_v24, %v1809_v20  ;;  %v1815_v33 = vadd.f32 %v1814_v32, %v5266_v11 }
 0x2a6   :  { %3617 = vst [vmem:[#allocation2 + $0x610] sm:$0xff] %v4321_v29  ;;  %v4325_v35 = vpack.c.bf16 %v1462_v31, %v1460_v25  ;;  %3618 = vst [vmem:[#allocation2 + $0x618] sm:$0xff] %v4322_v34  ;;  %v4326_v42 = vpack.c.bf16 %v1815_v33, %v1813_v30 }
 0x2a8   :  { %3621 = vst [vmem:[#allocation2 + $0x630] sm:$0xff] %v4325_v35  ;;  %v1465_v43 = vpop.f32.mrb[228].mxu0  ;;  %3622 = vst [vmem:[#allocation2 + $0x638] sm:$0xff] %v4326_v42  ;;  %v1818_v45 = vpop.f32.mrb[228].mxu1 }
 0x2a9   :  { %v1466_v44 = vadd.f32 %v1465_v43, %v5258_v60  ;;  %v1467_v38 = vpop.f32.mrb[229].mxu0  ;;  %v1819_v46 = vadd.f32 %v1818_v45, %v5261_v5  ;;  %v1820_v41 = vpop.f32.mrb[229].mxu1 }
 0x2aa   :  { %v1468_v47 = vadd.f32 %v1467_v38, %v5263_v10  ;;  %v1469_v48 = vpop.f32.mrb[230].mxu0  ;;  %v1821_v49 = vadd.f32 %v1820_v41, %v5266_v11  ;;  %v1822_v51 = vpop.f32.mrb[230].mxu1 }
 0x2ab   :  { %v1470_v50 = vadd.f32 %v1469_v48, %v5258_v60  ;;  %v1471_v8 = vpop.f32.mrb[231].mxu0  ;;  %v1823_v52 = vadd.f32 %v1822_v51, %v5261_v5  ;;  %v1824_v54 = vpop.f32.mrb[231].mxu1 }
 0x2ac   :  { %v4329_v23 = vpack.c.bf16 %v1468_v47, %v1466_v44  ;;  %v1472_v53 = vadd.f32 %v1471_v8, %v5263_v10  ;;  %v4330_v55 = vpack.c.bf16 %v1821_v49, %v1819_v46  ;;  %v1825_v56 = vadd.f32 %v1824_v54, %v5266_v11 }
 0x2ae   :  { %3625 = vst [vmem:[#allocation2 + $0x650] sm:$0xff] %v4329_v23  ;;  %v4333_v57 = vpack.c.bf16 %v1472_v53, %v1470_v50  ;;  %3626 = vst [vmem:[#allocation2 + $0x658] sm:$0xff] %v4330_v55  ;;  %v4334_v58 = vpack.c.bf16 %v1825_v56, %v1823_v52 }
 0x2b0   :  { %3629 = vst [vmem:[#allocation2 + $0x670] sm:$0xff] %v4333_v57  ;;  %v1475_v36 = vpop.f32.mrb[232].mxu0  ;;  %3630 = vst [vmem:[#allocation2 + $0x678] sm:$0xff] %v4334_v58  ;;  %v1828_v61 = vpop.f32.mrb[232].mxu1 }
 0x2b1   :  { %v1476_v59 = vadd.f32 %v1475_v36, %v5258_v60  ;;  %v1477_v62 = vpop.f32.mrb[233].mxu0  ;;  %v1829_v63 = vadd.f32 %v1828_v61, %v5261_v5  ;;  %v1830_v0 = vpop.f32.mrb[233].mxu1 }
 0x2b2   :  { %v1478_v39 = vadd.f32 %v1477_v62, %v5263_v10  ;;  %v1479_v1 = vpop.f32.mrb[234].mxu0  ;;  %v1831_v2 = vadd.f32 %v1830_v0, %v5266_v11  ;;  %v1832_v9 = vpop.f32.mrb[234].mxu1 }
 0x2b3   :  { %v1480_v7 = vadd.f32 %v1479_v1, %v5258_v60  ;;  %v1481_v3 = vpop.f32.mrb[235].mxu0  ;;  %v1833_v6 = vadd.f32 %v1832_v9, %v5261_v5  ;;  %v1834_v26 = vpop.f32.mrb[235].mxu1 }
 0x2b4   :  { %v4337_v4 = vpack.c.bf16 %v1478_v39, %v1476_v59  ;;  %v1482_v12 = vadd.f32 %v1481_v3, %v5263_v10  ;;  %v4338_v13 = vpack.c.bf16 %v1831_v2, %v1829_v63  ;;  %v1835_v14 = vadd.f32 %v1834_v26, %v5266_v11 }
 0x2b6   :  { %3633 = vst [vmem:[#allocation2 + $0x690] sm:$0xff] %v4337_v4  ;;  %v4341_v15 = vpack.c.bf16 %v1482_v12, %v1480_v7  ;;  %3634 = vst [vmem:[#allocation2 + $0x698] sm:$0xff] %v4338_v13  ;;  %v4342_v16 = vpack.c.bf16 %v1835_v14, %v1833_v6 }
 0x2b8   :  { %3637 = vst [vmem:[#allocation2 + $0x6b0] sm:$0xff] %v4341_v15  ;;  %v1485_v17 = vpop.f32.mrb[236].mxu0  ;;  %3638 = vst [vmem:[#allocation2 + $0x6b8] sm:$0xff] %v4342_v16  ;;  %v1838_v37 = vpop.f32.mrb[236].mxu1 }
 0x2b9   :  { %v1486_v18 = vadd.f32 %v1485_v17, %v5258_v60  ;;  %v1487_v19 = vpop.f32.mrb[237].mxu0  ;;  %v1839_v20 = vadd.f32 %v1838_v37, %v5261_v5  ;;  %v1840_v40 = vpop.f32.mrb[237].mxu1 }
 0x2ba   :  { %v1488_v21 = vadd.f32 %v1487_v19, %v5263_v10  ;;  %v1489_v22 = vpop.f32.mrb[238].mxu0  ;;  %v1841_v24 = vadd.f32 %v1840_v40, %v5266_v11  ;;  %v1842_v27 = vpop.f32.mrb[238].mxu1 }
 0x2bb   :  { %v1490_v25 = vadd.f32 %v1489_v22, %v5258_v60  ;;  %v1491_v28 = vpop.f32.mrb[239].mxu0  ;;  %v1843_v30 = vadd.f32 %v1842_v27, %v5261_v5  ;;  %v1844_v32 = vpop.f32.mrb[239].mxu1 }
 0x2bc   :  { %v4345_v29 = vpack.c.bf16 %v1488_v21, %v1486_v18  ;;  %v1492_v31 = vadd.f32 %v1491_v28, %v5263_v10  ;;  %v4346_v34 = vpack.c.bf16 %v1841_v24, %v1839_v20  ;;  %v1845_v33 = vadd.f32 %v1844_v32, %v5266_v11 }
 0x2be   :  { %3641 = vst [vmem:[#allocation2 + $0x6d0] sm:$0xff] %v4345_v29  ;;  %v4349_v35 = vpack.c.bf16 %v1492_v31, %v1490_v25  ;;  %3642 = vst [vmem:[#allocation2 + $0x6d8] sm:$0xff] %v4346_v34  ;;  %v4350_v42 = vpack.c.bf16 %v1845_v33, %v1843_v30 }
 0x2c0   :  { %3645 = vst [vmem:[#allocation2 + $0x6f0] sm:$0xff] %v4349_v35  ;;  %v1495_v43 = vpop.f32.mrb[240].mxu0  ;;  %3646 = vst [vmem:[#allocation2 + $0x6f8] sm:$0xff] %v4350_v42  ;;  %v1848_v45 = vpop.f32.mrb[240].mxu1 }
 0x2c1   :  { %v1496_v44 = vadd.f32 %v1495_v43, %v5258_v60  ;;  %v1497_v38 = vpop.f32.mrb[241].mxu0  ;;  %v1849_v46 = vadd.f32 %v1848_v45, %v5261_v5  ;;  %v1850_v41 = vpop.f32.mrb[241].mxu1 }
 0x2c2   :  { %v1498_v47 = vadd.f32 %v1497_v38, %v5263_v10  ;;  %v1499_v48 = vpop.f32.mrb[242].mxu0  ;;  %v1851_v49 = vadd.f32 %v1850_v41, %v5266_v11  ;;  %v1852_v51 = vpop.f32.mrb[242].mxu1 }
 0x2c3   :  { %v1500_v50 = vadd.f32 %v1499_v48, %v5258_v60  ;;  %v1501_v8 = vpop.f32.mrb[243].mxu0  ;;  %v1853_v52 = vadd.f32 %v1852_v51, %v5261_v5  ;;  %v1854_v54 = vpop.f32.mrb[243].mxu1 }
 0x2c4   :  { %v4353_v23 = vpack.c.bf16 %v1498_v47, %v1496_v44  ;;  %v1502_v53 = vadd.f32 %v1501_v8, %v5263_v10  ;;  %v4354_v55 = vpack.c.bf16 %v1851_v49, %v1849_v46  ;;  %v1855_v56 = vadd.f32 %v1854_v54, %v5266_v11 }
 0x2c6   :  { %3649 = vst [vmem:[#allocation2 + $0x710] sm:$0xff] %v4353_v23  ;;  %v4357_v57 = vpack.c.bf16 %v1502_v53, %v1500_v50  ;;  %3650 = vst [vmem:[#allocation2 + $0x718] sm:$0xff] %v4354_v55  ;;  %v4358_v58 = vpack.c.bf16 %v1855_v56, %v1853_v52 }
 0x2c8   :  { %3653 = vst [vmem:[#allocation2 + $0x730] sm:$0xff] %v4357_v57  ;;  %v1505_v36 = vpop.f32.mrb[244].mxu0  ;;  %3654 = vst [vmem:[#allocation2 + $0x738] sm:$0xff] %v4358_v58  ;;  %v1858_v61 = vpop.f32.mrb[244].mxu1 }
 0x2c9   :  { %v1506_v59 = vadd.f32 %v1505_v36, %v5258_v60  ;;  %v1507_v62 = vpop.f32.mrb[245].mxu0  ;;  %v1859_v63 = vadd.f32 %v1858_v61, %v5261_v5  ;;  %v1860_v0 = vpop.f32.mrb[245].mxu1 }
 0x2ca   :  { %v1508_v39 = vadd.f32 %v1507_v62, %v5263_v10  ;;  %v1509_v1 = vpop.f32.mrb[246].mxu0  ;;  %v1861_v2 = vadd.f32 %v1860_v0, %v5266_v11  ;;  %v1862_v9 = vpop.f32.mrb[246].mxu1 }
 0x2cb   :  { %v1510_v7 = vadd.f32 %v1509_v1, %v5258_v60  ;;  %v1511_v3 = vpop.f32.mrb[247].mxu0  ;;  %v1863_v6 = vadd.f32 %v1862_v9, %v5261_v5  ;;  %v1864_v26 = vpop.f32.mrb[247].mxu1 }
 0x2cc   :  { %v4361_v4 = vpack.c.bf16 %v1508_v39, %v1506_v59  ;;  %v1512_v12 = vadd.f32 %v1511_v3, %v5263_v10  ;;  %v4362_v13 = vpack.c.bf16 %v1861_v2, %v1859_v63  ;;  %v1865_v14 = vadd.f32 %v1864_v26, %v5266_v11 }
 0x2ce   :  { %3657 = vst [vmem:[#allocation2 + $0x750] sm:$0xff] %v4361_v4  ;;  %v4365_v15 = vpack.c.bf16 %v1512_v12, %v1510_v7  ;;  %3658 = vst [vmem:[#allocation2 + $0x758] sm:$0xff] %v4362_v13  ;;  %v4366_v16 = vpack.c.bf16 %v1865_v14, %v1863_v6 }
 0x2d0   :  { %3661 = vst [vmem:[#allocation2 + $0x770] sm:$0xff] %v4365_v15  ;;  %v1515_v17 = vpop.f32.mrb[248].mxu0  ;;  %3662 = vst [vmem:[#allocation2 + $0x778] sm:$0xff] %v4366_v16  ;;  %v1868_v37 = vpop.f32.mrb[248].mxu1 }
 0x2d1   :  { %v1516_v18 = vadd.f32 %v1515_v17, %v5258_v60  ;;  %v1517_v19 = vpop.f32.mrb[249].mxu0  ;;  %v1869_v20 = vadd.f32 %v1868_v37, %v5261_v5  ;;  %v1870_v40 = vpop.f32.mrb[249].mxu1 }
 0x2d2   :  { %v1518_v21 = vadd.f32 %v1517_v19, %v5263_v10  ;;  %v1519_v22 = vpop.f32.mrb[250].mxu0  ;;  %v1871_v24 = vadd.f32 %v1870_v40, %v5266_v11  ;;  %v1872_v27 = vpop.f32.mrb[250].mxu1 }
 0x2d3   :  { %v1520_v25 = vadd.f32 %v1519_v22, %v5258_v60  ;;  %v1521_v28 = vpop.f32.mrb[251].mxu0  ;;  %v1873_v30 = vadd.f32 %v1872_v27, %v5261_v5  ;;  %v1874_v32 = vpop.f32.mrb[251].mxu1 }
 0x2d4   :  { %v4369_v29 = vpack.c.bf16 %v1518_v21, %v1516_v18  ;;  %v1522_v31 = vadd.f32 %v1521_v28, %v5263_v10  ;;  %v4370_v34 = vpack.c.bf16 %v1871_v24, %v1869_v20  ;;  %v1875_v33 = vadd.f32 %v1874_v32, %v5266_v11 }
 0x2d6   :  { %3665 = vst [vmem:[#allocation2 + $0x790] sm:$0xff] %v4369_v29  ;;  %v4373_v35 = vpack.c.bf16 %v1522_v31, %v1520_v25  ;;  %3666 = vst [vmem:[#allocation2 + $0x798] sm:$0xff] %v4370_v34  ;;  %v4374_v42 = vpack.c.bf16 %v1875_v33, %v1873_v30 }
 0x2d8   :  { %3669 = vst [vmem:[#allocation2 + $0x7b0] sm:$0xff] %v4373_v35  ;;  %v1525_v43 = vpop.f32.mrb[252].mxu0  ;;  %3670 = vst [vmem:[#allocation2 + $0x7b8] sm:$0xff] %v4374_v42  ;;  %v1878_v45 = vpop.f32.mrb[252].mxu1 }
 0x2d9   :  { %v1526_v44 = vadd.f32 %v1525_v43, %v5258_v60  ;;  %v1527_v38 = vpop.f32.mrb[253].mxu0  ;;  %v1879_v46 = vadd.f32 %v1878_v45, %v5261_v5  ;;  %v1880_v41 = vpop.f32.mrb[253].mxu1 }
 0x2da   :  { %v1528_v47 = vadd.f32 %v1527_v38, %v5263_v10  ;;  %v1529_v48 = vpop.f32.mrb[254].mxu0  ;;  %v1881_v49 = vadd.f32 %v1880_v41, %v5266_v11  ;;  %v1882_v51 = vpop.f32.mrb[254].mxu1 }
 0x2db   :  { %v1530_v50 = vadd.f32 %v1529_v48, %v5258_v60  ;;  %v1531_v8 = vpop.f32.mrb[255].mxu0  ;;  %v1883_v52 = vadd.f32 %v1882_v51, %v5261_v5  ;;  %v1884_v54 = vpop.f32.mrb[255].mxu1 }
 0x2dc   :  { %v4377_v23 = vpack.c.bf16 %v1528_v47, %v1526_v44  ;;  %v1532_v53 = vadd.f32 %v1531_v8, %v5263_v10  ;;  %v4378_v55 = vpack.c.bf16 %v1881_v49, %v1879_v46  ;;  %v1885_v56 = vadd.f32 %v1884_v54, %v5266_v11 }
 0x2de   :  { %3673 = vst [vmem:[#allocation2 + $0x7d0] sm:$0xff] %v4377_v23  ;;  %v4381_v57 = vpack.c.bf16 %v1532_v53, %v1530_v50  ;;  %3674 = vst [vmem:[#allocation2 + $0x7d8] sm:$0xff] %v4378_v55  ;;  %v4382_v58 = vpack.c.bf16 %v1885_v56, %v1883_v52 }
 0x2e0   :  { %3677 = vst [vmem:[#allocation2 + $0x7f0] sm:$0xff] %v4381_v57  ;;  %3678 = vst [vmem:[#allocation2 + $0x7f8] sm:$0xff] %v4382_v58 }
 0x2e1   :  { %4454 = shalt.err (!%p4451_p4)
}
 0x2e2   :  { %s4455_s22 = scalar_lea.hbm %s5573_s3, 32768 }
 0x2e3   :  { %p4456_p5 = scmp.ne.s32.totalorder %s5573_s3, %s4455_s22  ;;  %p4459_p6 = scmp.lt.u32.totalorder %s4455_s22, %s5573_s3 }
 0x2e5   :  { %p4461_p7 = pnand %p4459_p6, %p4456_p5 }
 0x2e7   :  { %4464 = shalt.err (!%p4461_p7)
}
 0x2e8   :  { %s4469_s26 = smov 512   ;;  %s4470_s27 = smov 32  }
 0x2e9   :  { %3690 = dma.vmem_to_hbm [thread:$0]  %s3685_s18, 32768, %s5573_s3, [#allocation3], %s4469_s26, %s4469_s26, %s4470_s27  }
 0x2ea   :  { %4465 = dma.done.wait [#allocation3], 32768  }
 0x2eb   :  { %4466 = vsyncadd [#allocation3], 4294934528 }
 0x2ec   :  { %3694 = vsyncpa [#allocation3], 1 }

</bundles_post_ra>
